<compile_context>
chip_gen: v5e
topology: v5e:2x2
jax: 0.10.0
libtpu: 0.0.40
codegen_flags: <defaults>
</compile_context>

<pallas_src>
import functools

import jax
import jax.numpy as jnp
from jax import lax
from jax.experimental import pallas as pl
from jax.experimental.pallas import tpu as pltpu

block_size = 64     # max sequence length / causal mask size
n_embd = 384
head_size = 64
dropout_p = 0.2     # unused (eval-mode identity)


# ---------------------------------------------------------------------------
# Kernel
# ---------------------------------------------------------------------------
def _head_kernel(x_ref, wqkv_ref, bias_ref, o_ref):
    # x_ref:    (bb, T, C) f32
    # wqkv_ref: (C, 3H)    bf16, [k | q*scale | v]
    # bias_ref: (T, T)     f32 additive causal bias (0 / -inf)
    # o_ref:    (bb, T, H)
    bb, T, C = x_ref.shape
    H = o_ref.shape[-1]

    # Fused QKV projection on the MXU: bf16 inputs, f32 accumulation.
    x2d = x_ref[...].reshape(bb * T, C).astype(jnp.bfloat16)
    qkv = jnp.dot(x2d, wqkv_ref[...], preferred_element_type=jnp.float32)
    qkv = qkv.reshape(bb, T, 3 * H)

    k = qkv[:, :, 0:H].astype(jnp.bfloat16)
    q = qkv[:, :, H:2 * H].astype(jnp.bfloat16)      # 1/sqrt(H) folded into Wq
    v = qkv[:, :, 2 * H:3 * H].astype(jnp.bfloat16)

    # wei = q @ k^T  -- contract over H directly (no explicit transpose).
    wei = lax.dot_general(
        q, k,
        dimension_numbers=(((2,), (2,)), ((0,), (0,))),
        preferred_element_type=jnp.float32)           # (bb, T, T), f32

    # causal mask == masked_fill(tril == 0, -inf), as a precomputed bias
    wei = wei + bias_ref[...][None, :, :]

    # numerically stable softmax over last dim, all f32 (VPU/EUP path)
    m = jnp.max(wei, axis=-1, keepdims=True)
    e = jnp.exp(wei - m)
    denom = jnp.sum(e, axis=-1, keepdims=True)
    p = e * pl.reciprocal(denom, approx=True)

    # dropout: identity (eval mode)

    out = lax.dot_general(
        p.astype(jnp.bfloat16), v,
        dimension_numbers=(((2,), (1,)), ((0,), (0,))),
        preferred_element_type=jnp.float32)           # (bb, T, H)
    o_ref[...] = out.astype(o_ref.dtype)


# ---------------------------------------------------------------------------
# Batch-block policy
# ---------------------------------------------------------------------------
def _num_tensorcores():
    """Best-effort TensorCores-per-chip (v5e/v6e: 1, v7x: 2)."""
    n = 1
    try:
        info = pltpu.get_tpu_info()
        for attr in ("num_cores", "core_count", "num_tensorcores"):
            v = getattr(info, attr, None)
            if isinstance(v, int) and v > 0:
                n = v
                break
    except Exception:
        pass
    try:
        kind = jax.devices()[0].device_kind.lower()
        if "v7" in kind:
            n = max(n, 2)
    except Exception:
        pass
    return min(max(n, 1), 2)


def _pick_batch_block(B, T):
    """Rows per grid step: as large as possible (fills MXU M), but
    capped at 1024 rows so the f32 x block and the (bb,T,T) score temporaries
    stay VMEM-safe and the BlockSpec pipeline keeps >=2 steps to overlap on
    large batches.  On multi-TC chips keep >= 1 grid step per TensorCore."""
    num_tc = _num_tensorcores()
    max_rows = 1024
    for bb in sorted((d for d in range(1, B + 1) if B % d == 0), reverse=True):
        if bb * T > max_rows:
            continue
        steps = B // bb
        if num_tc > 1 and steps < num_tc and bb > 1:
            continue
        return bb
    return 1


# ---------------------------------------------------------------------------
# Wrapper
# ---------------------------------------------------------------------------
def make_head_params(w_key, w_query, w_value):
    """One-time weight fusion: (C, 3H) bf16 slab [k | q*scale | v]."""
    H = w_key.shape[1]
    scale = jnp.float32(H) ** -0.5
    w_qkv = jnp.concatenate(
        [w_key, w_query * scale, w_value], axis=1).astype(jnp.bfloat16)
    return w_qkv


def make_causal_bias(T):
    """(T, T) additive causal bias: 0 on/below diagonal, -inf above."""
    row = jnp.arange(T, dtype=jnp.int32)[:, None]
    col = jnp.arange(T, dtype=jnp.int32)[None, :]
    return jnp.where(col <= row, 0.0, -jnp.inf).astype(jnp.float32)


@functools.partial(jax.jit, static_argnames=("bb",))
def _head_forward_impl(x, w_qkv, bias, *, bb):
    B, T, C = x.shape
    H = w_qkv.shape[1] // 3
    return pl.pallas_call(
        _head_kernel,
        out_shape=jax.ShapeDtypeStruct((B, T, H), x.dtype),
        grid_spec=pltpu.PrefetchScalarGridSpec(
            num_scalar_prefetch=0,
            grid=(B // bb,),
            in_specs=[
                pl.BlockSpec((bb, T, C), lambda b: (b, 0, 0)),
                pl.BlockSpec((C, 3 * H), lambda b: (0, 0)),
                pl.BlockSpec((T, T), lambda b: (0, 0)),
            ],
            out_specs=pl.BlockSpec((bb, T, H), lambda b: (b, 0, 0)),
        ),
        compiler_params=pltpu.CompilerParams(
            dimension_semantics=("parallel",)),
    )(x, w_qkv, bias)


def head_forward(x, w_qkv, bias):
    """x: (B, T, C) f32; w_qkv: (C, 3H) bf16 fused weight; bias: (T, T) f32."""
    B, T, _ = x.shape
    bb = _pick_batch_block(B, T)
    return _head_forward_impl(x, w_qkv, bias, bb=bb)


# ---------------------------------------------------------------------------
# Pure-JAX reference (mirrors the PyTorch forward, eval mode, f32)
# ---------------------------------------------------------------------------
def _reference(x, w_key, w_query, w_value):
    k = x @ w_key
    q = x @ w_query
    v = x @ w_value
    wei = (q @ jnp.swapaxes(k, -2, -1)) * (k.shape[-1] ** -0.5)
    T = x.shape[1]
    tril = jnp.tril(jnp.ones((T, T), dtype=bool))
    wei = jnp.where(tril, wei, -jnp.inf)
    wei = jax.nn.softmax(wei, axis=-1)
    return wei @ v


if __name__ == "__main__":
    key = jax.random.PRNGKey(0)
    kx, kk, kq, kv = jax.random.split(key, 4)

    B, T = 2, block_size          # T <= block_size
    C, H = n_embd, head_size

    x = jax.random.normal(kx, (B, T, C), dtype=jnp.float32)
    # Deterministic init mimicking nn.Linear's uniform(-1/sqrt(C), 1/sqrt(C)),
    # stored pre-transposed as (C, H).
    bound = 1.0 / (C ** 0.5)
    w_key = jax.random.uniform(kk, (C, H), jnp.float32, -bound, bound)
    w_query = jax.random.uniform(kq, (C, H), jnp.float32, -bound, bound)
    w_value = jax.random.uniform(kv, (C, H), jnp.float32, -bound, bound)

    # One-time parameter fusion (done at init, not per forward call).
    w_qkv = make_head_params(w_key, w_query, w_value)
    bias = make_causal_bias(T)

    out = head_forward(x, w_qkv, bias)
    out = jax.block_until_ready(out)

    ref = _reference(x, w_key, w_query, w_value)
    assert out.shape == (B, T, H)
    # Tolerance loosened for bf16 MXU inputs + approx reciprocal.
    assert jnp.allclose(out, ref, atol=5e-2, rtol=5e-2), "mismatch vs reference"

    print("KERNEL_OK")
</pallas_src>

<mosaic_0001>
module attributes {stable_mosaic.version = 11 : i64} {
  func.func @_head_kernel(%arg0: i32, %arg1: memref<2x64x384xf32, #tpu.memory_space<vmem>>, %arg2: memref<384x192xbf16, #tpu.memory_space<vmem>>, %arg3: memref<64x64xf32, #tpu.memory_space<vmem>>, %arg4: memref<2x64x64xf32, #tpu.memory_space<vmem>>) attributes {dimension_semantics = [#tpu.dimension_semantics<parallel>], iteration_bounds = array<i64: 1>, scalar_prefetch = 0 : i64, scratch_operands = 0 : i64, tpu.core_type = #tpu.core_type<tc>, window_params = [{transform_indices = @transform_0, window_bounds = array<i64: 2, 64, 384>}, {pipeline_mode = #tpu.pipeline_mode<synchronous>, transform_indices = @transform_1, window_bounds = array<i64: 384, 192>}, {pipeline_mode = #tpu.pipeline_mode<synchronous>, transform_indices = @transform_2, window_bounds = array<i64: 64, 64>}, {transform_indices = @transform_3, window_bounds = array<i64: 2, 64, 64>}]} {
    %c0 = arith.constant 0 : index
    %c0_0 = arith.constant 0 : index
    %c0_1 = arith.constant 0 : index
    %0 = vector.load %arg1[%c0, %c0_0, %c0_1] : memref<2x64x384xf32, #tpu.memory_space<vmem>>, vector<2x64x384xf32>
    %1 = vector.shape_cast %0 : vector<2x64x384xf32> to vector<128x384xf32>
    %2 = arith.truncf %1 : vector<128x384xf32> to vector<128x384xbf16>
    %c0_2 = arith.constant 0 : index
    %c0_3 = arith.constant 0 : index
    %3 = vector.load %arg2[%c0_2, %c0_3] : memref<384x192xbf16, #tpu.memory_space<vmem>>, vector<384x192xbf16>
    %cst = arith.constant dense<0.000000e+00> : vector<128x192xf32>
    %4 = tpu.matmul %2, %3, %cst {dimension_numbers = #tpu.dot_dimension_numbers<[1], [0], [0], [1], [0, 0, 1, 1], [], []>} : vector<128x384xbf16>, vector<384x192xbf16>, vector<128x192xf32> -> vector<128x192xf32>
    %5 = vector.shape_cast %4 : vector<128x192xf32> to vector<2x64x192xf32>
    %6 = vector.extract_strided_slice %5 {offsets = [0, 0, 0], sizes = [2, 64, 64], strides = [1, 1, 1]} : vector<2x64x192xf32> to vector<2x64x64xf32>
    %7 = arith.truncf %6 : vector<2x64x64xf32> to vector<2x64x64xbf16>
    %8 = vector.extract_strided_slice %5 {offsets = [0, 0, 64], sizes = [2, 64, 64], strides = [1, 1, 1]} : vector<2x64x192xf32> to vector<2x64x64xf32>
    %9 = arith.truncf %8 : vector<2x64x64xf32> to vector<2x64x64xbf16>
    %10 = vector.extract_strided_slice %5 {offsets = [0, 0, 128], sizes = [2, 64, 64], strides = [1, 1, 1]} : vector<2x64x192xf32> to vector<2x64x64xf32>
    %11 = arith.truncf %10 : vector<2x64x64xf32> to vector<2x64x64xbf16>
    %cst_4 = arith.constant dense<0.000000e+00> : vector<2x64x64xf32>
    %12 = tpu.matmul %9, %7, %cst_4 {dimension_numbers = #tpu.dot_dimension_numbers<[2], [2], [1], [1], [0, 0, 0, 1, 1, 1], [0], [0]>} : vector<2x64x64xbf16>, vector<2x64x64xbf16>, vector<2x64x64xf32> -> vector<2x64x64xf32>
    %c0_5 = arith.constant 0 : index
    %c0_6 = arith.constant 0 : index
    %13 = vector.load %arg3[%c0_5, %c0_6] : memref<64x64xf32, #tpu.memory_space<vmem>>, vector<64x64xf32>
    %14 = vector.shape_cast %13 : vector<64x64xf32> to vector<1x64x64xf32>
    %15 = vector.broadcast %14 : vector<1x64x64xf32> to vector<2x64x64xf32>
    %16 = arith.addf %12, %15 : vector<2x64x64xf32>
    %cst_7 = arith.constant dense<0xFF800000> : vector<2x64xf32>
    %17 = vector.multi_reduction <maximumf>, %16, %cst_7 [2] : vector<2x64x64xf32> to vector<2x64xf32>
    %18 = vector.shape_cast %17 : vector<2x64xf32> to vector<2x64x1xf32>
    %19 = vector.broadcast %18 : vector<2x64x1xf32> to vector<2x64x64xf32>
    %20 = arith.subf %16, %19 : vector<2x64x64xf32>
    %21 = math.exp %20 : vector<2x64x64xf32>
    %cst_8 = arith.constant dense<0.000000e+00> : vector<2x64xf32>
    %22 = vector.multi_reduction <add>, %21, %cst_8 [2] : vector<2x64x64xf32> to vector<2x64xf32>
    %23 = vector.shape_cast %22 : vector<2x64xf32> to vector<2x64x1xf32>
    %24 = tpu.reciprocal %23 {approx = true} : vector<2x64x1xf32> -> vector<2x64x1xf32>
    %25 = vector.broadcast %24 : vector<2x64x1xf32> to vector<2x64x64xf32>
    %26 = arith.mulf %21, %25 : vector<2x64x64xf32>
    %27 = arith.truncf %26 : vector<2x64x64xf32> to vector<2x64x64xbf16>
    %cst_9 = arith.constant dense<0.000000e+00> : vector<2x64x64xf32>
    %28 = tpu.matmul %27, %11, %cst_9 {dimension_numbers = #tpu.dot_dimension_numbers<[2], [1], [1], [2], [0, 0, 0, 1, 1, 2], [0], [0]>} : vector<2x64x64xbf16>, vector<2x64x64xbf16>, vector<2x64x64xf32> -> vector<2x64x64xf32>
    %c0_10 = arith.constant 0 : index
    %c0_11 = arith.constant 0 : index
    %c0_12 = arith.constant 0 : index
    %29 = vector.load %arg4[%c0_10, %c0_11, %c0_12] : memref<2x64x64xf32, #tpu.memory_space<vmem>>, vector<2x64x64xf32>
    tpu.vector_store %arg4[%c0_10, %c0_11, %c0_12], %28 {strides = array<i32>} : memref<2x64x64xf32, #tpu.memory_space<vmem>>, vector<2x64x64xf32>,
    return
  }
  func.func @transform_0(%arg0: i32) -> (i32, i32, i32) {
    %c0_i32 = arith.constant 0 : i32
    %c0_i32_0 = arith.constant 0 : i32
    %c0_i32_1 = arith.constant 0 : i32
    return %arg0, %c0_i32, %c0_i32_0 : i32, i32, i32
  }
  func.func @transform_1(%arg0: i32) -> (i32, i32) {
    %c0_i32 = arith.constant 0 : i32
    %c0_i32_0 = arith.constant 0 : i32
    %c0_i32_1 = arith.constant 0 : i32
    return %c0_i32, %c0_i32_0 : i32, i32
  }
  func.func @transform_2(%arg0: i32) -> (i32, i32) {
    %c0_i32 = arith.constant 0 : i32
    %c0_i32_0 = arith.constant 0 : i32
    %c0_i32_1 = arith.constant 0 : i32
    return %c0_i32, %c0_i32_0 : i32, i32
  }
  func.func @transform_3(%arg0: i32) -> (i32, i32, i32) {
    %c0_i32 = arith.constant 0 : i32
    %c0_i32_0 = arith.constant 0 : i32
    %c0_i32_1 = arith.constant 0 : i32
    return %arg0, %c0_i32, %c0_i32_0 : i32, i32, i32
  }
}

</mosaic_0001>

<bundles_post_ra>
// kernel: _head_forward_impl.1
= control target key start
LH: loop header
LB: loop body
LE: loop exit
PB: predicated region body
PF: predicated region fallthrough
CT: control target
= control target key end

     0   :  { %s2424_s0 = inlined_call_operand.vmem [shape: f32[2,64,384], index: 0, kind: input, shape index: {}]   ;;  %s2425_s1 = inlined_call_operand.vmem [shape: bf16[384,192], index: 1, kind: input, shape index: {}]   ;;  %s2426_s2 = inlined_call_operand.vmem [shape: f32[64,64], index: 2, kind: input, shape index: {}]   ;;  %s2427_s3 = inlined_call_operand.hbm [shape: f32[2,64,64], index: 3, kind: output, shape index: {}]  }
   0x1   :  { %v1327_v0 = vld [vmem:[%s2425_s1 + $0x70] sm:$0xf]  ;;  %v1492_v1 = vld [vmem:[%s2425_s1 + $0x74] sm:$0xf0]  ;;  %v1319_v9 = vld [vmem:[%s2425_s1 + $0x60] sm:$0xf] }
   0x2   :  { %v1391_v2 = vld [vmem:[%s2425_s1 + $0xf0] sm:$0xf]  ;;  %v1328_v3 = vor.u32 %v1492_v1, %v1327_v0  ;;  %v1508_v4 = vld [vmem:[%s2425_s1 + $0xf4] sm:$0xf0]  ;;  %v1490_v10 = vld [vmem:[%s2425_s1 + $0x64] sm:$0xf0] }
   0x3   :  { %v1455_v5 = vld [vmem:[%s2425_s1 + $0x170] sm:$0xf]  ;;  %v1524_v6 = vld [vmem:[%s2425_s1 + $0x174] sm:$0xf0]  ;;  %v1392_v7 = vor.u32 %v1508_v4, %v1391_v2  ;;  %v1383_v11 = vld [vmem:[%s2425_s1 + $0xe0] sm:$0xf]  ;;  %v1320_v12 = vor.u32 %v1490_v10, %v1319_v9 }
   0x4   :  { %v1456_v8 = vor.u32 %v1524_v6, %v1455_v5  ;;  %376 = vmatpush.bf16.msra.mxu0 %v1328_v3  ;;  %v1506_v13 = vld [vmem:[%s2425_s1 + $0xe4] sm:$0xf0]  ;;  %v1447_v14 = vld [vmem:[%s2425_s1 + $0x160] sm:$0xf]  ;;  %v1311_v18 = vld [vmem:[%s2425_s1 + $0x50] sm:$0xf] }
   0x5   :  { %v1522_v15 = vld [vmem:[%s2425_s1 + $0x164] sm:$0xf0]  ;;  %425 = vmatpush.bf16.msra.mxu1 %v1392_v7  ;;  %v1384_v16 = vor.u32 %v1506_v13, %v1383_v11  ;;  %v1488_v19 = vld [vmem:[%s2425_s1 + $0x54] sm:$0xf0]  ;;  %v1375_v20 = vld [vmem:[%s2425_s1 + $0xd0] sm:$0xf] }
   0x6   :  { %474 = vmatpush.bf16.msra.mxu2 %v1456_v8  ;;  %v1448_v17 = vor.u32 %v1522_v15, %v1447_v14  ;;  %v1504_v21 = vld [vmem:[%s2425_s1 + $0xd4] sm:$0xf0]  ;;  %v1439_v22 = vld [vmem:[%s2425_s1 + $0x150] sm:$0xf]  ;;  %v1312_v24 = vor.u32 %v1488_v19, %v1311_v18  ;;  %v1303_v27 = vld [vmem:[%s2425_s1 + $0x40] sm:$0xf] }
   0x7   :  { %v1520_v23 = vld [vmem:[%s2425_s1 + $0x154] sm:$0xf0]  ;;  %v1376_v25 = vor.u32 %v1504_v21, %v1375_v20  ;;  %v1486_v28 = vld [vmem:[%s2425_s1 + $0x44] sm:$0xf0]  ;;  %v1367_v29 = vld [vmem:[%s2425_s1 + $0xc0] sm:$0xf] }
   0x8   :  { %377 = vmatpush.bf16.msra.mxu0 %v1320_v12  ;;  %v1440_v26 = vor.u32 %v1520_v23, %v1439_v22  ;;  %v1502_v30 = vld [vmem:[%s2425_s1 + $0xc4] sm:$0xf0]  ;;  %v1431_v31 = vld [vmem:[%s2425_s1 + $0x140] sm:$0xf]  ;;  %v1304_v33 = vor.u32 %v1486_v28, %v1303_v27  ;;  %v1295_v36 = vld [vmem:[%s2425_s1 + $0x30] sm:$0xf] }
   0x9   :  { %426 = vmatpush.bf16.msra.mxu1 %v1384_v16  ;;  %v1518_v32 = vld [vmem:[%s2425_s1 + $0x144] sm:$0xf0]  ;;  %v1368_v34 = vor.u32 %v1502_v30, %v1367_v29  ;;  %v1484_v37 = vld [vmem:[%s2425_s1 + $0x34] sm:$0xf0]  ;;  %v1359_v38 = vld [vmem:[%s2425_s1 + $0xb0] sm:$0xf] }
   0xa   :  { %475 = vmatpush.bf16.msra.mxu2 %v1448_v17  ;;  %v1432_v35 = vor.u32 %v1518_v32, %v1431_v31  ;;  %v1500_v39 = vld [vmem:[%s2425_s1 + $0xb4] sm:$0xf0]  ;;  %v1423_v40 = vld [vmem:[%s2425_s1 + $0x130] sm:$0xf]  ;;  %v1296_v42 = vor.u32 %v1484_v37, %v1295_v36  ;;  %v1287_v45 = vld [vmem:[%s2425_s1 + $0x20] sm:$0xf] }
   0xb   :  { %v1516_v41 = vld [vmem:[%s2425_s1 + $0x134] sm:$0xf0]  ;;  %v1360_v43 = vor.u32 %v1500_v39, %v1359_v38  ;;  %v1482_v46 = vld [vmem:[%s2425_s1 + $0x24] sm:$0xf0]  ;;  %v1351_v47 = vld [vmem:[%s2425_s1 + $0xa0] sm:$0xf] }
   0xc   :  { %378 = vmatpush.bf16.msra.mxu0 %v1312_v24  ;;  %v1424_v44 = vor.u32 %v1516_v41, %v1423_v40  ;;  %v1498_v48 = vld [vmem:[%s2425_s1 + $0xa4] sm:$0xf0]  ;;  %v1415_v49 = vld [vmem:[%s2425_s1 + $0x120] sm:$0xf]  ;;  %v1288_v51 = vor.u32 %v1482_v46, %v1287_v45  ;;  %v1279_v52 = vld [vmem:[%s2425_s1 + $0x10] sm:$0xf] }
   0xd   :  { %427 = vmatpush.bf16.msra.mxu1 %v1376_v25  ;;  %v1514_v50 = vld [vmem:[%s2425_s1 + $0x124] sm:$0xf0]  ;;  %v1352_v53 = vor.u32 %v1498_v48, %v1351_v47  ;;  %v1480_v55 = vld [vmem:[%s2425_s1 + $0x14] sm:$0xf0]  ;;  %v1343_v56 = vld [vmem:[%s2425_s1 + $0x90] sm:$0xf] }
   0xe   :  { %476 = vmatpush.bf16.msra.mxu2 %v1440_v26  ;;  %v1416_v54 = vor.u32 %v1514_v50, %v1415_v49 }
  0x10   :  { %379 = vmatpush.bf16.msra.mxu0 %v1304_v33 }
  0x11   :  { %428 = vmatpush.bf16.msra.mxu1 %v1368_v34 }
  0x12   :  { %477 = vmatpush.bf16.msra.mxu2 %v1432_v35 }
  0x14   :  { %380 = vmatpush.bf16.msra.mxu0 %v1296_v42 }
  0x15   :  { %429 = vmatpush.bf16.msra.mxu1 %v1360_v43 }
  0x16   :  { %478 = vmatpush.bf16.msra.mxu2 %v1424_v44 }
  0x17   :  { %8 = vsyncpa [#allocation3], 0  ;;  %v1496_v57 = vld [vmem:[%s2425_s1 + $0x94] sm:$0xf0]  ;;  %v1407_v58 = vld [vmem:[%s2425_s1 + $0x110] sm:$0xf]  ;;  %v1280_v60 = vor.u32 %v1480_v55, %v1279_v52 }
  0x18   :  { %v1512_v59 = vld [vmem:[%s2425_s1 + $0x114] sm:$0xf0]  ;;  %381 = vmatpush.bf16.msra.mxu0 %v1288_v51  ;;  %v1344_v61 = vor.u32 %v1496_v57, %v1343_v56  ;;  %v1271_v63 = vld [vmem:[%s2425_s1] sm:$0xf]  ;;  %v1478_v0 = vld [vmem:[%s2425_s1 + $0x4] sm:$0xf0] }
  0x19   :  { %430 = vmatpush.bf16.msra.mxu1 %v1352_v53  ;;  %v1408_v62 = vor.u32 %v1512_v59, %v1407_v58  ;;  %v1335_v1 = vld [vmem:[%s2425_s1 + $0x80] sm:$0xf]  ;;  %v1494_v2 = vld [vmem:[%s2425_s1 + $0x84] sm:$0xf0]  ;;  %v1272_v5 = vor.u32 %v1478_v0, %v1271_v63  ;;  %v19_v7 = vld [vmem:[%s2424_s0 + $0x18] sm:$0xff]  ;;  %vm738_vm0 = vcmask 523264  }
  0x1a   :  { %479 = vmatpush.bf16.msra.mxu2 %v1416_v54  ;;  %v1399_v3 = vld [vmem:[%s2425_s1 + $0x100] sm:$0xf]  ;;  %v1510_v4 = vld [vmem:[%s2425_s1 + $0x104] sm:$0xf0]  ;;  %v1336_v9 = vor.u32 %v1494_v2, %v1335_v1  ;;  %v18_v12 = vld [vmem:[%s2424_s0 + $0x10] sm:$0xff]  ;;  %s1257_s21 = sshll.u32 %s2427_s3, 4  ;;  %s1258_s21 = int_to_ptr.hbm [resolvable:$true] %s1257_s21 }
  0x1b   :  { %v16_v6 = vld [vmem:[%s2424_s0] sm:$0xff]  ;;  %v17_v8 = vld [vmem:[%s2424_s0 + $0x8] sm:$0xff]  ;;  %v1400_v10 = vor.u32 %v1510_v4, %v1399_v3  ;;  %v22_v17 = vld [vmem:[%s2424_s0 + $0x30] sm:$0xff]  ;;  %s1621_s22 = smov 128   ;;  %s1622_s23 = smov 8  }
  0x1c   :  { %382 = vmatpush.bf16.msra.mxu0 %v1280_v60  ;;  %v20_v11 = vld [vmem:[%s2424_s0 + $0x20] sm:$0xff]  ;;  %v21_v13 = vld [vmem:[%s2424_s0 + $0x28] sm:$0xff]  ;;  %v1805_v14 = vpack.c.bf16 %v19_v7, %v16_v6  ;;  %v23_v19 = vld [vmem:[%s2424_s0 + $0x38] sm:$0xff] }
  0x1d   :  { %431 = vmatpush.bf16.msra.mxu1 %v1344_v61  ;;  %v1807_v15 = vpack.c.bf16 %v20_v11, %v17_v8  ;;  %v1809_v16 = vpack.c.bf16 %v21_v13, %v18_v12  ;;  %v25_v18 = vld [vmem:[%s2424_s0 + $0x48] sm:$0xff]  ;;  %v26_v20 = vld [vmem:[%s2424_s0 + $0x50] sm:$0xff]  ;;  %v24_v21 = vld [vmem:[%s2424_s0 + $0x40] sm:$0xff] }
  0x1e   :  { %480 = vmatpush.bf16.msra.mxu2 %v1408_v62  ;;  %v27_v22 = vld [vmem:[%s2424_s0 + $0x58] sm:$0xff]  ;;  %v1832_v23 = vpack.c.bf16 %v25_v18, %v22_v17  ;;  %v1834_v24 = vpack.c.bf16 %v26_v20, %v23_v19  ;;  %v28_v26 = vld [vmem:[%s2424_s0 + $0x60] sm:$0xff]  ;;  %v29_v28 = vld [vmem:[%s2424_s0 + $0x68] sm:$0xff] }
  0x1f   :  { %v1836_v25 = vpack.c.bf16 %v27_v22, %v24_v21  ;;  %v31_v27 = vld [vmem:[%s2424_s0 + $0x78] sm:$0xff]  ;;  %v32_v29 = vld [vmem:[%s2424_s0 + $0x80] sm:$0xff]  ;;  %v30_v30 = vld [vmem:[%s2424_s0 + $0x70] sm:$0xff] }
  0x20   :  { %383 = vmatpush.bf16.msra.mxu0 %v1272_v5  ;;  %v33_v31 = vld [vmem:[%s2424_s0 + $0x88] sm:$0xff]  ;;  %v1859_v32 = vpack.c.bf16 %v31_v27, %v28_v26  ;;  %v1861_v33 = vpack.c.bf16 %v32_v29, %v29_v28  ;;  %v34_v35 = vld [vmem:[%s2424_s0 + $0x90] sm:$0xff]  ;;  %v35_v37 = vld [vmem:[%s2424_s0 + $0x98] sm:$0xff] }
  0x21   :  { %432 = vmatpush.bf16.msra.mxu1 %v1336_v9  ;;  %v1863_v34 = vpack.c.bf16 %v33_v31, %v30_v30  ;;  %v37_v36 = vld [vmem:[%s2424_s0 + $0xa8] sm:$0xff]  ;;  %v38_v38 = vld [vmem:[%s2424_s0 + $0xb0] sm:$0xff]  ;;  %v36_v39 = vld [vmem:[%s2424_s0 + $0xa0] sm:$0xff] }
  0x22   :  { %481 = vmatpush.bf16.msra.mxu2 %v1400_v10  ;;  %v39_v40 = vld [vmem:[%s2424_s0 + $0xb8] sm:$0xff]  ;;  %v1886_v41 = vpack.c.bf16 %v37_v36, %v34_v35  ;;  %v1888_v42 = vpack.c.bf16 %v38_v38, %v35_v37  ;;  %v40_v44 = vld [vmem:[%s2424_s0 + $0xc0] sm:$0xff]  ;;  %v41_v46 = vld [vmem:[%s2424_s0 + $0xc8] sm:$0xff] }
  0x23   :  { %384 = vmatmul.bf16.vlgmr.msra.gmra.mxu0 %v1805_v14  ;;  %v1890_v43 = vpack.c.bf16 %v39_v40, %v36_v39  ;;  %v43_v45 = vld [vmem:[%s2424_s0 + $0xd8] sm:$0xff]  ;;  %v44_v47 = vld [vmem:[%s2424_s0 + $0xe0] sm:$0xff]  ;;  %v42_v48 = vld [vmem:[%s2424_s0 + $0xd0] sm:$0xff] }
  0x24   :  { %433 = vmatmul.bf16.vlgmr.msra.gmra.mxu1 %v1807_v15  ;;  %v45_v49 = vld [vmem:[%s2424_s0 + $0xe8] sm:$0xff]  ;;  %v1913_v50 = vpack.c.bf16 %v43_v45, %v40_v44  ;;  %v1915_v51 = vpack.c.bf16 %v44_v47, %v41_v46  ;;  %v1491_v53 = vld [vmem:[%s2425_s1 + $0x74] sm:$0xf]  ;;  %v1329_v54 = vld [vmem:[%s2425_s1 + $0x78] sm:$0xf0] }
  0x25   :  { %482 = vmatmul.bf16.vlgmr.msra.gmra.mxu2 %v1809_v16  ;;  %v1917_v52 = vpack.c.bf16 %v45_v49, %v42_v48  ;;  %v1332_v55 = vor.u32 %v1491_v53, %v1329_v54  ;;  %v1489_v56 = vld [vmem:[%s2425_s1 + $0x64] sm:$0xf]  ;;  %v1321_v57 = vld [vmem:[%s2425_s1 + $0x68] sm:$0xf0]  ;;  %v46_v58 = vld [vmem:[%s2424_s0 + $0xf0] sm:$0xff] }
  0x26   :  { %v49_v59 = vld [vmem:[%s2424_s0 + $0x108] sm:$0xff]  ;;  %v1324_v60 = vor.u32 %v1489_v56, %v1321_v57  ;;  %v47_v61 = vld [vmem:[%s2424_s0 + $0xf8] sm:$0xff]  ;;  %v1507_v62 = vld [vmem:[%s2425_s1 + $0xf4] sm:$0xf] }
  0x27   :  { %523 = vmatpush.bf16.msra.mxu3 %v1332_v55  ;;  %v1393_v63 = vld [vmem:[%s2425_s1 + $0xf8] sm:$0xf0]  ;;  %v50_v0 = vld [vmem:[%s2424_s0 + $0x110] sm:$0xff]  ;;  %v48_v1 = vld [vmem:[%s2424_s0 + $0x100] sm:$0xff]  ;;  %v1970_v9 = vpack.c.bf16 %v49_v59, %v46_v58 }
  0x28   :  { %v51_v2 = vld [vmem:[%s2424_s0 + $0x118] sm:$0xff]  ;;  %v1396_v3 = vor.u32 %v1507_v62, %v1393_v63  ;;  %v1487_v4 = vld [vmem:[%s2425_s1 + $0x54] sm:$0xf]  ;;  %v1505_v11 = vld [vmem:[%s2425_s1 + $0xe4] sm:$0xf]  ;;  %v1978_v13 = vpack.c.bf16 %v50_v0, %v47_v61 }
  0x29   :  { %v1313_v5 = vld [vmem:[%s2425_s1 + $0x58] sm:$0xf0]  ;;  %v1523_v6 = vld [vmem:[%s2425_s1 + $0x174] sm:$0xf]  ;;  %v1385_v12 = vld [vmem:[%s2425_s1 + $0xe8] sm:$0xf0]  ;;  %v1980_v17 = vpack.c.bf16 %v51_v2, %v48_v1 }
  0x2a   :  { %572 = vmatpush.bf16.msrb.mxu0 %v1396_v3  ;;  %v1316_v7 = vor.u32 %v1487_v4, %v1313_v5  ;;  %v1457_v8 = vld [vmem:[%s2425_s1 + $0x178] sm:$0xf0]  ;;  %v1388_v18 = vor.u32 %v1505_v11, %v1385_v12  ;;  %v1485_v19 = vld [vmem:[%s2425_s1 + $0x44] sm:$0xf]  ;;  %v1305_v20 = vld [vmem:[%s2425_s1 + $0x48] sm:$0xf0] }
  0x2b   :  { %524 = vmatpush.bf16.msra.mxu3 %v1324_v60  ;;  %v1460_v10 = vor.u32 %v1523_v6, %v1457_v8  ;;  %v1308_v21 = vor.u32 %v1485_v19, %v1305_v20  ;;  %v1521_v22 = vld [vmem:[%s2425_s1 + $0x164] sm:$0xf]  ;;  %v1449_v26 = vld [vmem:[%s2425_s1 + $0x168] sm:$0xf0]  ;;  %v1503_v27 = vld [vmem:[%s2425_s1 + $0xd4] sm:$0xf] }
  0x2c   :  { %v1452_v28 = vor.u32 %v1521_v22, %v1449_v26  ;;  %v1377_v29 = vld [vmem:[%s2425_s1 + $0xd8] sm:$0xf0]  ;;  %v1483_v31 = vld [vmem:[%s2425_s1 + $0x34] sm:$0xf]  ;;  %v1501_v40 = vld [vmem:[%s2425_s1 + $0xc4] sm:$0xf] }
  0x2d   :  { %621 = vmatpush.bf16.msrb.mxu1 %v1460_v10  ;;  %v1380_v30 = vor.u32 %v1503_v27, %v1377_v29  ;;  %v1297_v35 = vld [vmem:[%s2425_s1 + $0x38] sm:$0xf0]  ;;  %v1519_v36 = vld [vmem:[%s2425_s1 + $0x154] sm:$0xf]  ;;  %v1369_v44 = vld [vmem:[%s2425_s1 + $0xc8] sm:$0xf0] }
  0x2e   :  { %573 = vmatpush.bf16.msrb.mxu0 %v1388_v18  ;;  %v1300_v37 = vor.u32 %v1483_v31, %v1297_v35  ;;  %v1441_v38 = vld [vmem:[%s2425_s1 + $0x158] sm:$0xf0]  ;;  %v1372_v45 = vor.u32 %v1501_v40, %v1369_v44  ;;  %v1481_v46 = vld [vmem:[%s2425_s1 + $0x24] sm:$0xf]  ;;  %v1289_v47 = vld [vmem:[%s2425_s1 + $0x28] sm:$0xf0] }
  0x2f   :  { %525 = vmatpush.bf16.msra.mxu3 %v1316_v7  ;;  %v1444_v39 = vor.u32 %v1519_v36, %v1441_v38  ;;  %v1517_v48 = vld [vmem:[%s2425_s1 + $0x144] sm:$0xf]  ;;  %v55_v53 = vld [vmem:[%s2424_s0 + $0x138] sm:$0xff]  ;;  %v1292_v54 = vor.u32 %v1481_v46, %v1289_v47  ;;  %v1433_v55 = vld [vmem:[%s2425_s1 + $0x148] sm:$0xf0] }
  0x30   :  { %v52_v49 = vld [vmem:[%s2424_s0 + $0x120] sm:$0xff]  ;;  %v53_v56 = vld [vmem:[%s2424_s0 + $0x128] sm:$0xff]  ;;  %v1436_v57 = vor.u32 %v1517_v48, %v1433_v55  ;;  %v1499_v58 = vld [vmem:[%s2425_s1 + $0xb4] sm:$0xf] }
  0x31   :  { %622 = vmatpush.bf16.msrb.mxu1 %v1452_v28  ;;  %v1361_v59 = vld [vmem:[%s2425_s1 + $0xb8] sm:$0xf0]  ;;  %v56_v60 = vld [vmem:[%s2424_s0 + $0x140] sm:$0xff]  ;;  %v54_v61 = vld [vmem:[%s2424_s0 + $0x130] sm:$0xff]  ;;  %v2069_v5 = vpack.c.bf16 %v55_v53, %v52_v49 }
  0x32   :  { %574 = vmatpush.bf16.msrb.mxu0 %v1380_v30  ;;  %v57_v62 = vld [vmem:[%s2424_s0 + $0x148] sm:$0xff]  ;;  %v1364_v63 = vor.u32 %v1499_v58, %v1361_v59  ;;  %v1479_v0 = vld [vmem:[%s2425_s1 + $0x14] sm:$0xf]  ;;  %v1281_v1 = vld [vmem:[%s2425_s1 + $0x18] sm:$0xf0]  ;;  %v2077_v10 = vpack.c.bf16 %v56_v60, %v53_v56 }
  0x33   :  { %389 = vmatmul.bf16.gmra.mxu0 %v1832_v23  ;;  %526 = vmatpush.bf16.msra.mxu3 %v1308_v21  ;;  %v1515_v2 = vld [vmem:[%s2425_s1 + $0x134] sm:$0xf]  ;;  %v1284_v3 = vor.u32 %v1479_v0, %v1281_v1  ;;  %v1425_v4 = vld [vmem:[%s2425_s1 + $0x138] sm:$0xf0]  ;;  %v1497_v7 = vld [vmem:[%s2425_s1 + $0xa4] sm:$0xf]  ;;  %v2079_v11 = vpack.c.bf16 %v57_v62, %v54_v61 }
  0x34   :  { %438 = vmatmul.bf16.gmra.mxu1 %v1834_v24  ;;  %v1428_v6 = vor.u32 %v1515_v2, %v1425_v4  ;;  %v1353_v8 = vld [vmem:[%s2425_s1 + $0xa8] sm:$0xf0]  ;;  %v1477_v18 = vld [vmem:[%s2425_s1 + $0x4] sm:$0xf]  ;;  %v1495_v27 = vld [vmem:[%s2425_s1 + $0x94] sm:$0xf] }
  0x35   :  { %487 = vmatmul.bf16.gmra.mxu2 %v1836_v25  ;;  %623 = vmatpush.bf16.msrb.mxu1 %v1444_v39  ;;  %v1356_v12 = vor.u32 %v1497_v7, %v1353_v8  ;;  %v1273_v19 = vld [vmem:[%s2425_s1 + $0x8] sm:$0xf0]  ;;  %v1513_v20 = vld [vmem:[%s2425_s1 + $0x124] sm:$0xf]  ;;  %v1345_v28 = vld [vmem:[%s2425_s1 + $0x98] sm:$0xf0] }
  0x36   :  { %575 = vmatpush.bf16.msrb.mxu0 %v1372_v45  ;;  %v1276_v21 = vor.u32 %v1477_v18, %v1273_v19  ;;  %v1417_v22 = vld [vmem:[%s2425_s1 + $0x128] sm:$0xf0]  ;;  %v1348_v29 = vor.u32 %v1495_v27, %v1345_v28  ;;  %v1511_v30 = vld [vmem:[%s2425_s1 + $0x114] sm:$0xf]  ;;  %v1409_v31 = vld [vmem:[%s2425_s1 + $0x118] sm:$0xf0] }
  0x37   :  { %527 = vmatpush.bf16.msra.mxu3 %v1300_v37  ;;  %v1420_v26 = vor.u32 %v1513_v20, %v1417_v22  ;;  %v1412_v35 = vor.u32 %v1511_v30, %v1409_v31  ;;  %v1493_v36 = vld [vmem:[%s2425_s1 + $0x84] sm:$0xf]  ;;  %v1337_v37 = vld [vmem:[%s2425_s1 + $0x88] sm:$0xf0]  ;;  %v58_v45 = vld [vmem:[%s2424_s0 + $0x150] sm:$0xff] }
  0x38   :  { %v1340_v38 = vor.u32 %v1493_v36, %v1337_v37  ;;  %v1509_v39 = vld [vmem:[%s2425_s1 + $0x104] sm:$0xf]  ;;  %v1401_v40 = vld [vmem:[%s2425_s1 + $0x108] sm:$0xf0]  ;;  %v59_v46 = vld [vmem:[%s2424_s0 + $0x158] sm:$0xff] }
  0x39   :  { %624 = vmatpush.bf16.msrb.mxu1 %v1436_v57  ;;  %v1404_v44 = vor.u32 %v1509_v39, %v1401_v40  ;;  %v62_v47 = vld [vmem:[%s2424_s0 + $0x170] sm:$0xff]  ;;  %v60_v48 = vld [vmem:[%s2424_s0 + $0x160] sm:$0xff]  ;;  %v63_v49 = vld [vmem:[%s2424_s0 + $0x178] sm:$0xff] }
  0x3a   :  { %576 = vmatpush.bf16.msrb.mxu0 %v1364_v63  ;;  %v2143_v55 = vpack.c.bf16 %v63_v49, %v60_v48 }
  0x3b   :  { %528 = vmatpush.bf16.msra.mxu3 %v1292_v54  ;;  %v2141_v54 = vpack.c.bf16 %v62_v47, %v59_v46 }
  0x3d   :  { %625 = vmatpush.bf16.msrb.mxu1 %v1428_v6 }
  0x3e   :  { %577 = vmatpush.bf16.msrb.mxu0 %v1356_v12 }
  0x3f   :  { %529 = vmatpush.bf16.msra.mxu3 %v1284_v3 }
  0x41   :  { %626 = vmatpush.bf16.msrb.mxu1 %v1420_v26 }
  0x42   :  { %578 = vmatpush.bf16.msrb.mxu0 %v1348_v29 }
  0x43   :  { %394 = vmatmul.bf16.gmra.mxu0 %v1859_v32  ;;  %530 = vmatpush.bf16.msra.mxu3 %v1276_v21 }
  0x44   :  { %443 = vmatmul.bf16.gmra.mxu1 %v1861_v33 }
  0x45   :  { %492 = vmatmul.bf16.gmra.mxu2 %v1863_v34  ;;  %627 = vmatpush.bf16.msrb.mxu1 %v1412_v35 }
  0x46   :  { %531 = vmatmul.bf16.vlgmr.msra.gmra.mxu3 %v1805_v14  ;;  %v61_v14 = vld [vmem:[%s2424_s0 + $0x168] sm:$0xff]  ;;  %579 = vmatpush.bf16.msrb.mxu0 %v1340_v38  ;;  %s1619_s0 = smov 64  }
  0x47   :  { %v2139_v53 = vpack.c.bf16 %v61_v14, %v58_v45 }
  0x49   :  { %628 = vmatpush.bf16.msrb.mxu1 %v1404_v44 }
  0x53   :  { %399 = vmatmul.bf16.gmra.mxu0 %v1886_v41 }
  0x54   :  { %448 = vmatmul.bf16.gmra.mxu1 %v1888_v42 }
  0x55   :  { %497 = vmatmul.bf16.gmra.mxu2 %v1890_v43 }
  0x56   :  { %536 = vmatmul.bf16.gmra.mxu3 %v1832_v23 }
  0x63   :  { %404 = vmatmul.bf16.gmra.mxu0 %v1913_v50 }
  0x64   :  { %453 = vmatmul.bf16.gmra.mxu1 %v1915_v51 }
  0x65   :  { %502 = vmatmul.bf16.gmra.mxu2 %v1917_v52 }
  0x66   :  { %541 = vmatmul.bf16.gmra.mxu3 %v1859_v32 }
  0x73   :  { %409 = vmatmul.bf16.gmra.mxu0 %v1970_v9 }
  0x74   :  { %458 = vmatmul.bf16.gmra.mxu1 %v1978_v13 }
  0x75   :  { %507 = vmatmul.bf16.gmra.mxu2 %v1980_v17 }
  0x76   :  { %546 = vmatmul.bf16.gmra.mxu3 %v1886_v41 }
  0x83   :  { %414 = vmatmul.bf16.gmra.mxu0 %v2069_v5 }
  0x84   :  { %463 = vmatmul.bf16.gmra.mxu1 %v2077_v10 }
  0x85   :  { %512 = vmatmul.bf16.gmra.mxu2 %v2079_v11 }
  0x86   :  { %551 = vmatmul.bf16.gmra.mxu3 %v1913_v50 }
  0x93   :  { %419 = vmatmul.bf16.gmra.mxu0 %v2139_v53 }
  0x94   :  { %468 = vmatmul.bf16.gmra.mxu1 %v2141_v54 }
  0x95   :  { %517 = vmatmul.bf16.gmra.mxu2 %v2143_v55 }
  0x96   :  { %556 = vmatmul.bf16.gmra.mxu3 %v1970_v9 }
  0xa0   :  { %v385_v56 = vpop.f32.mrf.mxu0 }
  0xa1   :  { %v434_v57 = vpop.f32.mrf.mxu1 }
  0xa2   :  { %v435_v59 = vadd.f32 %v434_v57, %v385_v56 }
  0xa3   :  { %580 = vmatmul.bf16.vlgmr.msrb.gmra.mxu0 %v1807_v15 }
  0xa4   :  { %629 = vmatmul.bf16.vlgmr.msrb.gmra.mxu1 %v1809_v16 }
  0xa6   :  { %561 = vmatmul.bf16.gmra.mxu3 %v2069_v5 }
  0xa8   :  { %v483_v58 = vpop.f32.mrf.mxu2  ;;  %v387_v60 = vpop.f32.mrf.mxu0 }
  0xa9   :  { %v436_v61 = vpop.f32.mrf.mxu1  ;;  %v484_v62 = vadd.f32 %v483_v58, %v435_v59 }
  0xaa   :  { %v437_v63 = vadd.f32 %v436_v61, %v387_v60 }
  0xab   :  { %v670_v1 = vpack.c.bf16 %v484_v62, %v484_v62 }
  0xad   :  { %v718_v6 = vunpack.c.l.b16 %v670_v1 }
  0xb0   :  { %v485_v0 = vpop.f32.mrf.mxu2  ;;  %v390_v3 = vpop.f32.mrf.mxu0 }
  0xb1   :  { %v486_v2 = vadd.f32 %v485_v0, %v437_v63  ;;  %v439_v4 = vpop.f32.mrf.mxu1 }
  0xb2   :  { %v440_v8 = vadd.f32 %v439_v4, %v390_v3 }
  0xb3   :  { %v671_v23 = vpack.c.bf16 %v486_v2, %v486_v2  ;;  %585 = vmatmul.bf16.gmra.mxu0 %v1834_v24 }
  0xb4   :  { %634 = vmatmul.bf16.gmra.mxu1 %v1836_v25 }
  0xb5   :  { %v719_v15 = vunpack.c.l.b16 %v671_v23 }
  0xb6   :  { %566 = vmatmul.bf16.gmra.mxu3 %v2139_v53 }
  0xb7   :  { %v2154_v16 = vpack.c.b16 %v719_v15, %v718_v6 }
  0xb8   :  { %v488_v7 = vpop.f32.mrf.mxu2  ;;  %v392_v32 = vpop.f32.mrf.mxu0 }
  0xb9   :  { %730 = vrot.lane.b32.xlu0 %v2154_v16, %s1619_s0  ;;  %v441_v12 = vpop.f32.mrf.mxu1  ;;  %v489_v18 = vadd.f32 %v488_v7, %v440_v8 }
  0xba   :  { %v442_v19 = vadd.f32 %v441_v12, %v392_v32 }
  0xbb   :  { %v672_v24 = vpack.c.bf16 %v489_v18, %v489_v18 }
  0xbd   :  { %v720_v27 = vunpack.c.l.b16 %v672_v24 }
  0xc0   :  { %v490_v20 = vpop.f32.mrf.mxu2  ;;  %v395_v22 = vpop.f32.mrf.mxu0 }
  0xc1   :  { %v491_v21 = vadd.f32 %v490_v20, %v442_v19  ;;  %v444_v26 = vpop.f32.mrf.mxu1 }
  0xc2   :  { %v445_v31 = vadd.f32 %v444_v26, %v395_v22 }
  0xc3   :  { %v673_v25 = vpack.c.bf16 %v491_v21, %v491_v21  ;;  %590 = vmatmul.bf16.gmra.mxu0 %v1861_v33 }
  0xc4   :  { %639 = vmatmul.bf16.gmra.mxu1 %v1863_v34 }
  0xc5   :  { %v721_v28 = vunpack.c.l.b16 %v673_v25 }
  0xc7   :  { %v2161_v29 = vpack.c.b16 %v721_v28, %v720_v27 }
  0xc8   :  { %v493_v30 = vpop.f32.mrf.mxu2  ;;  %v397_v41 = vpop.f32.mrf.mxu0 }
  0xc9   :  { %732 = vrot.lane.b32.xlu1 %v2161_v29, %s1619_s0  ;;  %v446_v35 = vpop.f32.mrf.mxu1  ;;  %v494_v36 = vadd.f32 %v493_v30, %v445_v31  ;;  %v755_v22 = vsel %vm738_vm0, %v2161_v29, 0  ;;  %v752_v31 = vsel %vm738_vm0, %v2154_v16, 0 }
  0xca   :  { %v447_v37 = vadd.f32 %v446_v35, %v397_v41 }
  0xcb   :  { %v674_v39 = vpack.c.bf16 %v494_v36, %v494_v36 }
  0xcd   :  { %v722_v34 = vunpack.c.l.b16 %v674_v39 }
  0xd0   :  { %v495_v38 = vpop.f32.mrf.mxu2  ;;  %v400_v40 = vpop.f32.mrf.mxu0 }
  0xd1   :  { %v496_v33 = vadd.f32 %v495_v38, %v447_v37  ;;  %v449_v44 = vpop.f32.mrf.mxu1 }
  0xd2   :  { %v450_v48 = vadd.f32 %v449_v44, %v400_v40  ;;  %v532_v40 = vpop.f32.mrf.mxu3 }
  0xd3   :  { %v675_v45 = vpack.c.bf16 %v496_v33, %v496_v33  ;;  %595 = vmatmul.bf16.gmra.mxu0 %v1888_v42 }
  0xd4   :  { %644 = vmatmul.bf16.gmra.mxu1 %v1890_v43 }
  0xd5   :  { %v723_v14 = vunpack.c.l.b16 %v675_v45 }
  0xd7   :  { %v728_v46 = vpack.c.b16 %v723_v14, %v722_v34 }
  0xd8   :  { %v498_v47 = vpop.f32.mrf.mxu2  ;;  %v402_v50 = vpop.f32.mrf.mxu0 }
  0xd9   :  { %734 = vrot.lane.b32.xlu2 %v728_v46, %s1619_s0  ;;  %v451_v49 = vpop.f32.mrf.mxu1  ;;  %v499_v56 = vadd.f32 %v498_v47, %v450_v48  ;;  %v758_v32 = vsel %vm738_vm0, %v728_v46, 0 }
  0xda   :  { %v452_v57 = vadd.f32 %v451_v49, %v402_v50  ;;  %v2191_v48 = vpop.f32.mrf.mxu3 }
  0xdb   :  { %v676_v59 = vpack.c.bf16 %v499_v56, %v499_v56 }
  0xdd   :  { %v724_v43 = vunpack.c.l.b16 %v676_v59 }
  0xe0   :  { %v500_v58 = vpop.f32.mrf.mxu2  ;;  %v405_v61 = vpop.f32.mrf.mxu0 }
  0xe1   :  { %v501_v60 = vadd.f32 %v500_v58, %v452_v57  ;;  %v454_v42 = vpop.f32.mrf.mxu1 }
  0xe2   :  { %v455_v2 = vadd.f32 %v454_v42, %v405_v61 }
  0xe3   :  { %v677_v62 = vpack.c.bf16 %v501_v60, %v501_v60  ;;  %600 = vmatmul.bf16.gmra.mxu0 %v1915_v51  ;;  %v537_v60 = vpop.f32.mrf.mxu3 }
  0xe4   :  { %649 = vmatmul.bf16.gmra.mxu1 %v1917_v52 }
  0xe5   :  { %v725_v63 = vunpack.c.l.b16 %v677_v62 }
  0xe7   :  { %v729_v0 = vpack.c.b16 %v725_v63, %v724_v43 }
  0xe8   :  { %v503_v1 = vpop.f32.mrf.mxu2  ;;  %v407_v9 = vpop.f32.mrf.mxu0 }
  0xe9   :  { %v761_v3 = vsel %vm738_vm0, %v729_v0, 0  ;;  %v456_v4 = vpop.f32.mrf.mxu1  ;;  %v504_v23 = vadd.f32 %v503_v1, %v455_v2 }
  0xea   :  { %767 = vmatpush.bf16.xpose.msrb.mxu2 %v761_v3  ;;  %v457_v6 = vadd.f32 %v456_v4, %v407_v9 }
  0xeb   :  { %v678_v7 = vpack.c.bf16 %v504_v23, %v504_v23  ;;  %v539_v2 = vpop.f32.mrf.mxu3 }
  0xed   :  { %v800_v18 = vunpack.c.l.b16 %v678_v7 }
  0xf0   :  { %v505_v15 = vpop.f32.mrf.mxu2  ;;  %v410_v8 = vpop.f32.mrf.mxu0 }
  0xf1   :  { %v506_v51 = vadd.f32 %v505_v15, %v457_v6  ;;  %v459_v52 = vpop.f32.mrf.mxu1 }
  0xf2   :  { %768 = vmatpush.bf16.xpose.msrb.mxu2 %v758_v32  ;;  %v460_v24 = vadd.f32 %v459_v52, %v410_v8 }
  0xf3   :  { %v679_v12 = vpack.c.bf16 %v506_v51, %v506_v51  ;;  %605 = vmatmul.bf16.gmra.mxu0 %v1978_v13  ;;  %v542_v51 = vpop.f32.mrf.mxu3 }
  0xf4   :  { %654 = vmatmul.bf16.gmra.mxu1 %v1980_v17 }
  0xf5   :  { %v801_v19 = vunpack.c.l.b16 %v679_v12 }
  0xf7   :  { %v2177_v5 = vpack.c.b16 %v801_v19, %v800_v18 }
  0xf8   :  { %v508_v20 = vpop.f32.mrf.mxu2  ;;  %v412_v21 = vpop.f32.mrf.mxu0 }
  0xf9   :  { %812 = vrot.lane.b32.xlu0 %v2177_v5, %s1619_s0  ;;  %v461_v26 = vpop.f32.mrf.mxu1  ;;  %v509_v13 = vadd.f32 %v508_v20, %v460_v24 }
  0xfa   :  { %769 = vmatpush.bf16.xpose.msrb.mxu2 %v755_v22  ;;  %v462_v25 = vadd.f32 %v461_v26, %v412_v21  ;;  %v833_v26 = vsel %vm738_vm0, %v2177_v5, 0 }
  0xfb   :  { %v680_v28 = vpack.c.bf16 %v509_v13, %v509_v13  ;;  %v544_v18 = vpop.f32.mrf.mxu3 }
  0xfd   :  { %v802_v29 = vunpack.c.l.b16 %v680_v28 }
 0x100   :  { %v510_v27 = vpop.f32.mrf.mxu2  ;;  %v415_v30 = vpop.f32.mrf.mxu0 }
 0x101   :  { %v511_v17 = vadd.f32 %v510_v27, %v462_v25  ;;  %736 = vrot.lane.b32.xlu0 %v729_v0, %s1619_s0  ;;  %v464_v41 = vpop.f32.mrf.mxu1 }
 0x102   :  { %770 = vmatpush.bf16.xpose.msrb.mxu2 %v752_v31  ;;  %v465_v38 = vadd.f32 %v464_v41, %v415_v30 }
 0x103   :  { %v681_v35 = vpack.c.bf16 %v511_v17, %v511_v17  ;;  %610 = vmatmul.bf16.gmra.mxu0 %v2077_v10  ;;  %v547_v22 = vpop.f32.mrf.mxu3 }
 0x104   :  { %659 = vmatmul.bf16.gmra.mxu1 %v2079_v11 }
 0x105   :  { %v803_v53 = vunpack.c.l.b16 %v681_v35 }
 0x107   :  { %v809_v36 = vpack.c.b16 %v803_v53, %v802_v29 }
 0x108   :  { %v513_v37 = vpop.f32.mrf.mxu2  ;;  %v417_v39 = vpop.f32.mrf.mxu0 }
 0x109   :  { %814 = vrot.lane.b32.xlu1 %v809_v36, %s1619_s0  ;;  %v466_v33 = vpop.f32.mrf.mxu1  ;;  %v514_v44 = vadd.f32 %v513_v37, %v465_v38  ;;  %v836_v19 = vsel %vm738_vm0, %v809_v36, 0 }
 0x10a   :  { %v467_v45 = vadd.f32 %v466_v33, %v417_v39 }
 0x10b   :  { %v682_v34 = vpack.c.bf16 %v514_v44, %v514_v44  ;;  %v549_v27 = vpop.f32.mrf.mxu3 }
 0x10d   :  { %v804_v11 = vunpack.c.l.b16 %v682_v34 }
 0x110   :  { %v515_v16 = vpop.f32.mrf.mxu2  ;;  %v420_v46 = vpop.f32.mrf.mxu0 }
 0x111   :  { %v516_v14 = vadd.f32 %v515_v16, %v467_v45  ;;  %v469_v47 = vpop.f32.mrf.mxu1 }
 0x112   :  { %v470_v57 = vadd.f32 %v469_v47, %v420_v46 }
 0x113   :  { %v683_v10 = vpack.c.bf16 %v516_v14, %v516_v14  ;;  %615 = vmatmul.bf16.gmra.mxu0 %v2141_v54  ;;  %v552_v41 = vpop.f32.mrf.mxu3 }
 0x114   :  { %664 = vmatmul.bf16.gmra.mxu1 %v2143_v55 }
 0x115   :  { %v805_v50 = vunpack.c.l.b16 %v683_v10 }
 0x117   :  { %v810_v49 = vpack.c.b16 %v805_v50, %v804_v11 }
 0x118   :  { %v518_v56 = vpop.f32.mrf.mxu2  ;;  %v422_v58 = vpop.f32.mrf.mxu0 }
 0x119   :  { %816 = vrot.lane.b32.xlu2 %v810_v49, %s1619_s0  ;;  %v471_v59 = vpop.f32.mrf.mxu1  ;;  %v519_v61 = vadd.f32 %v518_v56, %v470_v57  ;;  %v839_v32 = vsel %vm738_vm0, %v810_v49, 0 }
 0x11a   :  { %v472_v42 = vadd.f32 %v471_v59, %v422_v58 }
 0x11b   :  { %v684_v43 = vpack.c.bf16 %v519_v61, %v519_v61  ;;  %v2205_v46 = vpop.f32.mrf.mxu3 }
 0x11d   :  { %v806_v9 = vunpack.c.l.b16 %v684_v43 }
 0x120   :  { %v520_v62 = vpop.f32.mrf.mxu2  ;;  %v581_v54 = vpop.f32.mrf.mxu0 }
 0x121   :  { %v521_v63 = vadd.f32 %v520_v62, %v472_v42  ;;  %v630_v0 = vpop.f32.mrf.mxu1  ;;  %v582_v7 = vadd.f32 %v581_v54, %v532_v40 }
 0x123   :  { %v685_v1 = vpack.c.bf16 %v521_v63, %v521_v63  ;;  %v631_v8 = vadd.f32 %v630_v0, %v582_v7 }
 0x125   :  { %v807_v3 = vunpack.c.l.b16 %v685_v1  ;;  %v686_v54 = vpack.c.bf16 %v631_v8, %v631_v8 }
 0x127   :  { %v811_v55 = vpack.c.b16 %v807_v3, %v806_v9  ;;  %v557_v9 = vpop.f32.mrf.mxu3  ;;  %v1093_v3 = vunpack.c.l.b16 %v686_v54 }
 0x128   :  { %v583_v23 = vpop.f32.mrf.mxu0 }
 0x129   :  { %818 = vrot.lane.b32.xlu1 %v811_v55, %s1619_s0  ;;  %v842_v4 = vsel %vm738_vm0, %v811_v55, 0  ;;  %v632_v6 = vpop.f32.mrf.mxu1  ;;  %v584_v34 = vadd.f32 %v583_v23, %v2191_v48 }
 0x12a   :  { %848 = vmatpush.bf16.xpose.msrb.mxu3 %v842_v4 }
 0x12b   :  { %v731_v15 = vpop.permute.xlu0 %730  ;;  %v633_v57 = vadd.f32 %v632_v6, %v584_v34 }
 0x12c   :  { %1461 = vmatmul.msk.bf16.vlgmr.msrb.gmra.mxu2 %vm738_vm0, %v731_v15 }
 0x12d   :  { %v687_v48 = vpack.c.bf16 %v633_v57, %v633_v57 }
 0x12f   :  { %v1094_v55 = vunpack.c.l.b16 %v687_v48 }
 0x130   :  { %v586_v52 = vpop.f32.mrf.mxu0 }
 0x131   :  { %v635_v12 = vpop.f32.mrf.mxu1  ;;  %v587_v39 = vadd.f32 %v586_v52, %v537_v60  ;;  %v1101_v7 = vpack.c.b16 %v1094_v55, %v1093_v3  ;;  %v702_v3 = vld [vmem:[%s2426_s2] sm:$0xff] }
 0x132   :  { %849 = vmatpush.bf16.xpose.msrb.mxu3 %v839_v32 }
 0x133   :  { %v735_v30 = vpop.permute.xlu2 %734  ;;  %v636_v47 = vadd.f32 %v635_v12, %v587_v39 }
 0x135   :  { %v688_v59 = vpack.c.bf16 %v636_v47, %v636_v47 }
 0x137   :  { %v1095_v0 = vunpack.c.l.b16 %v688_v59 }
 0x138   :  { %v588_v20 = vpop.f32.mrf.mxu0 }
 0x139   :  { %v637_v24 = vpop.f32.mrf.mxu1  ;;  %v589_v33 = vadd.f32 %v588_v20, %v539_v2 }
 0x13a   :  { %850 = vmatpush.bf16.xpose.msrb.mxu3 %v836_v19 }
 0x13b   :  { %v733_v21 = vpop.permute.xlu1 %732  ;;  %v638_v10 = vadd.f32 %v637_v24, %v589_v33 }
 0x13c   :  { %1462 = vmatmul.msk.bf16.gmra.mxu2 %vm738_vm0, %v733_v21 }
 0x13d   :  { %v689_v60 = vpack.c.bf16 %v638_v10, %v638_v10 }
 0x13f   :  { %v1096_v1 = vunpack.c.l.b16 %v689_v60 }
 0x140   :  { %v591_v13 = vpop.f32.mrf.mxu0 }
 0x141   :  { %v640_v25 = vpop.f32.mrf.mxu1  ;;  %v592_v53 = vadd.f32 %v591_v13, %v542_v51  ;;  %v1102_v4 = vpack.c.b16 %v1096_v1, %v1095_v0  ;;  %v559_v51 = vpop.f32.mrf.mxu3 }
 0x142   :  { %851 = vmatpush.bf16.xpose.msrb.mxu3 %v833_v26 }
 0x143   :  { %v641_v38 = vadd.f32 %v640_v25, %v592_v53 }
 0x145   :  { %v690_v14 = vpack.c.bf16 %v641_v38, %v641_v38 }
 0x147   :  { %v1097_v58 = vunpack.c.l.b16 %v690_v14 }
 0x148   :  { %v593_v28 = vpop.f32.mrf.mxu0 }
 0x149   :  { %v642_v17 = vpop.f32.mrf.mxu1  ;;  %v594_v36 = vadd.f32 %v593_v28, %v544_v18  ;;  %v562_v18 = vpop.f32.mrf.mxu3 }
 0x14b   :  { %v643_v5 = vadd.f32 %v642_v17, %v594_v36 }
 0x14c   :  { %1463 = vmatmul.msk.bf16.gmra.mxu2 %vm738_vm0, %v735_v30 }
 0x14d   :  { %v691_v11 = vpack.c.bf16 %v643_v5, %v643_v5 }
 0x14f   :  { %v1098_v61 = vunpack.c.l.b16 %v691_v11 }
 0x150   :  { %v596_v31 = vpop.f32.mrf.mxu0 }
 0x151   :  { %v597_v35 = vadd.f32 %v596_v31, %v547_v22  ;;  %v645_v29 = vpop.f32.mrf.mxu1  ;;  %v1103_v2 = vpack.c.b16 %v1098_v61, %v1097_v58  ;;  %v564_v13 = vpop.f32.mrf.mxu3 }
 0x153   :  { %v646_v37 = vadd.f32 %v645_v29, %v597_v35 }
 0x155   :  { %v692_v44 = vpack.c.bf16 %v646_v37, %v646_v37 }
 0x157   :  { %v1099_v49 = vunpack.c.l.b16 %v692_v44 }
 0x158   :  { %v598_v40 = vpop.f32.mrf.mxu0 }
 0x159   :  { %v599_v45 = vadd.f32 %v598_v40, %v549_v27  ;;  %v647_v16 = vpop.f32.mrf.mxu1  ;;  %v567_v17 = vpop.f32.mrf.mxu3 }
 0x15b   :  { %v648_v50 = vadd.f32 %v647_v16, %v599_v45 }
 0x15d   :  { %v693_v56 = vpack.c.bf16 %v648_v50, %v648_v50 }
 0x15f   :  { %v1100_v42 = vunpack.c.l.b16 %v693_v56 }
 0x160   :  { %v601_v62 = vpop.f32.mrf.mxu0 }
 0x161   :  { %v1104_v43 = vpack.c.b16 %v1100_v42, %v1099_v49  ;;  %v650_v63 = vpop.f32.mrf.mxu1  ;;  %v602_v24 = vadd.f32 %v601_v62, %v552_v41  ;;  %v569_v39 = vpop.f32.mrf.mxu3 }
 0x163   :  { %1125 = vmatpush.bf16.msra.mxu2 %v1104_v43  ;;  %v651_v21 = vadd.f32 %v650_v63, %v602_v24 }
 0x165   :  { %v694_v43 = vpack.c.bf16 %v651_v21, %v651_v21 }
 0x167   :  { %1126 = vmatpush.bf16.msra.mxu2 %v1103_v2  ;;  %v1178_v1 = vunpack.c.l.b16 %v694_v43 }
 0x168   :  { %v603_v23 = vpop.f32.mrf.mxu0 }
 0x169   :  { %v652_v6 = vpop.f32.mrf.mxu1  ;;  %v604_v47 = vadd.f32 %v603_v23, %v2205_v46 }
 0x16b   :  { %v813_v15 = vpop.permute.xlu0 %812  ;;  %1127 = vmatpush.bf16.msra.mxu2 %v1102_v4  ;;  %v653_v59 = vadd.f32 %v652_v6, %v604_v47  ;;  %v703_v6 = vld [vmem:[%s2426_s2 + $0x8] sm:$0xff] }
 0x16c   :  { %1465 = vmatmul.msk.bf16.vlgmr.msrb.gmra.mxu3 %vm738_vm0, %v813_v15 }
 0x16d   :  { %v695_v63 = vpack.c.bf16 %v653_v59, %v653_v59 }
 0x16f   :  { %1128 = vmatpush.bf16.msra.mxu2 %v1101_v7  ;;  %v1179_v46 = vunpack.c.l.b16 %v695_v63 }
 0x170   :  { %v606_v8 = vpop.f32.mrf.mxu0 }
 0x171   :  { %v655_v32 = vpop.f32.mrf.mxu1  ;;  %v607_v37 = vadd.f32 %v606_v8, %v557_v9  ;;  %v1186_v9 = vpack.c.b16 %v1179_v46, %v1178_v1 }
 0x173   :  { %v737_v52 = vpop.permute.xlu0 %736  ;;  %v817_v28 = vpop.permute.xlu2 %816  ;;  %v656_v34 = vadd.f32 %v655_v32, %v607_v37  ;;  %v705_v32 = vld [vmem:[%s2426_s2 + $0x18] sm:$0xff]  ;;  %v707_v37 = vld [vmem:[%s2426_s2 + $0x28] sm:$0xff] }
 0x174   :  { %1464 = vmatmul.msk.bf16.gmra.mxu2 %vm738_vm0, %v737_v52 }
 0x175   :  { %v696_v57 = vpack.c.bf16 %v656_v34, %v656_v34 }
 0x177   :  { %v1180_v54 = vunpack.c.l.b16 %v696_v57 }
 0x178   :  { %v608_v12 = vpop.f32.mrf.mxu0 }
 0x179   :  { %v657_v19 = vpop.f32.mrf.mxu1  ;;  %v609_v41 = vadd.f32 %v608_v12, %v559_v51 }
 0x17b   :  { %v815_v20 = vpop.permute.xlu1 %814  ;;  %v658_v10 = vadd.f32 %v657_v19, %v609_v41  ;;  %v706_v19 = vld [vmem:[%s2426_s2 + $0x20] sm:$0xff] }
 0x17c   :  { %1466 = vmatmul.msk.bf16.gmra.mxu3 %vm738_vm0, %v815_v20 }
 0x17d   :  { %v697_v60 = vpack.c.bf16 %v658_v10, %v658_v10  ;;  %v709_v10 = vld [vmem:[%s2426_s2 + $0x38] sm:$0xff] }
 0x17f   :  { %v1181_v48 = vunpack.c.l.b16 %v697_v60 }
 0x180   :  { %v611_v22 = vpop.f32.mrf.mxu0 }
 0x181   :  { %v660_v26 = vpop.f32.mrf.mxu1  ;;  %v612_v35 = vadd.f32 %v611_v22, %v562_v18  ;;  %v1187_v2 = vpack.c.b16 %v1181_v48, %v1180_v54 }
 0x183   :  { %v661_v38 = vadd.f32 %v660_v26, %v612_v35 }
 0x185   :  { %v698_v14 = vpack.c.bf16 %v661_v38, %v661_v38 }
 0x187   :  { %v1182_v58 = vunpack.c.l.b16 %v698_v14 }
 0x188   :  { %v613_v25 = vpop.f32.mrf.mxu0 }
 0x189   :  { %v662_v27 = vpop.f32.mrf.mxu1  ;;  %v614_v53 = vadd.f32 %v613_v25, %v564_v13 }
 0x18b   :  { %v663_v33 = vadd.f32 %v662_v27, %v614_v53 }
 0x18c   :  { %1467 = vmatmul.msk.bf16.gmra.mxu3 %vm738_vm0, %v817_v28 }
 0x18d   :  { %v699_v11 = vpack.c.bf16 %v663_v33, %v663_v33 }
 0x18f   :  { %v1183_v61 = vunpack.c.l.b16 %v699_v11 }
 0x190   :  { %v616_v30 = vpop.f32.mrf.mxu0 }
 0x191   :  { %v665_v31 = vpop.f32.mrf.mxu1  ;;  %v617_v29 = vadd.f32 %v616_v30, %v567_v17  ;;  %v1188_v0 = vpack.c.b16 %v1183_v61, %v1182_v58  ;;  %v704_v17 = vld [vmem:[%s2426_s2 + $0x10] sm:$0xff] }
 0x193   :  { %v666_v36 = vadd.f32 %v665_v31, %v617_v29 }
 0x195   :  { %v700_v40 = vpack.c.bf16 %v666_v36, %v666_v36 }
 0x197   :  { %v1184_v49 = vunpack.c.l.b16 %v700_v40 }
 0x198   :  { %v618_v5 = vpop.f32.mrf.mxu0 }
 0x199   :  { %v619_v44 = vadd.f32 %v618_v5, %v569_v39  ;;  %v667_v45 = vpop.f32.mrf.mxu1 }
 0x19b   :  { %v819_v16 = vpop.permute.xlu1 %818  ;;  %v668_v50 = vadd.f32 %v667_v45, %v619_v44  ;;  %v708_v44 = vld [vmem:[%s2426_s2 + $0x30] sm:$0xff]  ;;  %s1620_s2 = smov [#allocation2]  }
 0x19c   :  { %1468 = vmatmul.msk.bf16.gmra.mxu3 %vm738_vm0, %v819_v16  ;;  %s1255_s18 = sshll.u32 %s1620_s2, 4  ;;  %s1256_s18 = int_to_ptr.vmem [resolvable:$true] %s1255_s18 }
 0x19d   :  { %v701_v56 = vpack.c.bf16 %v668_v50, %v668_v50 }
 0x19f   :  { %v1185_v42 = vunpack.c.l.b16 %v701_v56 }
 0x1a1   :  { %v1189_v62 = vpack.c.b16 %v1185_v42, %v1184_v49 }
 0x1a3   :  { %1210 = vmatpush.bf16.msra.mxu3 %v1189_v62 }
 0x1a7   :  { %1211 = vmatpush.bf16.msra.mxu3 %v1188_v0 }
 0x1ab   :  { %1212 = vmatpush.bf16.msra.mxu3 %v1187_v2 }
 0x1af   :  { %v772_v55 = vpop.f32.mrf.mxu2  ;;  %1213 = vmatpush.bf16.msra.mxu3 %v1186_v9 }
 0x1b0   :  { %v2216_v4 = vadd.f32 %v772_v55, %v702_v3 }
 0x1b2   :  { %v873_v23 = vsel %vm738_vm0, %v2216_v4, -inf }
 0x1b3   :  { %874 = vmax.xlane.f32.xlu2 %v873_v23 }
 0x1b7   :  { %v774_v15 = vpop.f32.mrf.mxu2 }
 0x1b8   :  { %v2223_v7 = vadd.f32 %v774_v15, %v703_v6 }
 0x1ba   :  { %v876_v51 = vsel %vm738_vm0, %v2223_v7, -inf }
 0x1bb   :  { %877 = vmax.xlane.f32.xlu0 %v876_v51 }
 0x1bf   :  { %v777_v8 = vpop.f32.mrf.mxu2 }
 0x1c0   :  { %v2252_v30 = vadd.f32 %v777_v8, %v704_v17 }
 0x1c2   :  { %v879_v53 = vsel %vm738_vm0, %v2252_v30, -inf }
 0x1c7   :  { %v779_v52 = vpop.f32.mrf.mxu2 }
 0x1c8   :  { %v2230_v12 = vadd.f32 %v779_v52, %v705_v32 }
 0x1ca   :  { %v882_v18 = vsel %vm738_vm0, %v2230_v12, -inf }
 0x1cb   :  { %883 = vmax.xlane.f32.xlu0 %v882_v18 }
 0x1cf   :  { %v782_v20 = vpop.f32.mrf.mxu2 }
 0x1d0   :  { %v2237_v24 = vadd.f32 %v782_v20, %v706_v19 }
 0x1d2   :  { %v885_v21 = vsel %vm738_vm0, %v2237_v24, -inf }
 0x1d3   :  { %886 = vmax.xlane.f32.xlu0 %v885_v21 }
 0x1d7   :  { %v784_v29 = vpop.f32.mrf.mxu2 }
 0x1d8   :  { %v2263_v38 = vadd.f32 %v784_v29, %v707_v37 }
 0x1da   :  { %v888_v40 = vsel %vm738_vm0, %v2263_v38, -inf }
 0x1ef   :  { %v853_v22 = vpop.f32.mrf.mxu3 }
 0x1f0   :  { %v2241_v26 = vadd.f32 %v853_v22, %v702_v3 }
 0x1f2   :  { %v897_v13 = vsel %vm738_vm0, %v2241_v26, -inf }
 0x1f3   :  { %898 = vmax.xlane.f32.xlu1 %v897_v13 }
 0x1f7   :  { %v855_v25 = vpop.f32.mrf.mxu3  ;;  %v787_v33 = vpop.f32.mrf.mxu2 }
 0x1f8   :  { %v2245_v27 = vadd.f32 %v855_v25, %v703_v6  ;;  %v2274_v45 = vadd.f32 %v787_v33, %v708_v44 }
 0x1fa   :  { %v900_v28 = vsel %vm738_vm0, %v2245_v27, -inf  ;;  %v891_v47 = vsel %vm738_vm0, %v2274_v45, -inf }
 0x1fb   :  { %901 = vmax.xlane.f32.xlu2 %v900_v28 }
 0x1ff   :  { %v858_v31 = vpop.f32.mrf.mxu3  ;;  %v789_v11 = vpop.f32.mrf.mxu2 }
 0x200   :  { %v2254_v35 = vadd.f32 %v858_v31, %v704_v17  ;;  %v2285_v50 = vadd.f32 %v789_v11, %v709_v10 }
 0x202   :  { %v903_v36 = vsel %vm738_vm0, %v2254_v35, -inf  ;;  %v894_v58 = vsel %vm738_vm0, %v2285_v50, -inf }
 0x203   :  { %880 = vmax.xlane.f32.xlu2 %v879_v53  ;;  %904 = vmax.xlane.f32.xlu1 %v903_v36 }
 0x207   :  { %v860_v39 = vpop.f32.mrf.mxu3 }
 0x208   :  { %v2265_v41 = vadd.f32 %v860_v39, %v705_v32 }
 0x20a   :  { %v906_v5 = vsel %vm738_vm0, %v2265_v41, -inf }
 0x20b   :  { %907 = vmax.xlane.f32.xlu2 %v906_v5  ;;  %889 = vmax.xlane.f32.xlu1 %v888_v40 }
 0x20f   :  { %v863_v16 = vpop.f32.mrf.mxu3 }
 0x210   :  { %v2276_v34 = vadd.f32 %v863_v16, %v706_v19 }
 0x212   :  { %v909_v14 = vsel %vm738_vm0, %v2276_v34, -inf }
 0x213   :  { %910 = vmax.xlane.f32.xlu2 %v909_v14  ;;  %892 = vmax.xlane.f32.xlu1 %v891_v47 }
 0x217   :  { %v865_v49 = vpop.f32.mrf.mxu3 }
 0x218   :  { %v2287_v56 = vadd.f32 %v865_v49, %v707_v37 }
 0x21a   :  { %v912_v57 = vsel %vm738_vm0, %v2287_v56, -inf }
 0x21b   :  { %913 = vmax.xlane.f32.xlu0 %v912_v57  ;;  %895 = vmax.xlane.f32.xlu2 %v894_v58 }
 0x21f   :  { %v868_v59 = vpop.f32.mrf.mxu3 }
 0x220   :  { %v2293_v60 = vadd.f32 %v868_v59, %v708_v44 }
 0x222   :  { %v915_v61 = vsel %vm738_vm0, %v2293_v60, -inf }
 0x223   :  { %916 = vmax.xlane.f32.xlu0 %v915_v61 }
 0x226   :  { %v875_v42 = vpop.xlane.xlu2 %874 }
 0x227   :  { %v921_v62 = vsub.f32 %v2216_v4, %v875_v42  ;;  %v870_v43 = vpop.f32.mrf.mxu3 }
 0x228   :  { %v2298_v63 = vadd.f32 %v870_v43, %v709_v10 }
 0x229   :  { %v937_v54 = vmul.f32 1.442695, %v921_v62 }
 0x22a   :  { %v918_v48 = vsel %vm738_vm0, %v2298_v63, -inf }
 0x22b   :  { %1529 = vpow2.f32 %v937_v54  ;;  %919 = vmax.xlane.f32.xlu1 %v918_v48 }
 0x22e   :  { %v878_v0 = vpop.xlane.xlu0 %877 }
 0x22f   :  { %v922_v1 = vsub.f32 %v2223_v7, %v878_v0 }
 0x231   :  { %v2303_v46 = vpop.eup %1529  ;;  %v939_v2 = vmul.f32 1.442695, %v922_v1 }
 0x232   :  { %v969_v9 = vsel %vm738_vm0, %v2303_v46, 0.0 }
 0x233   :  { %1531 = vpow2.f32 %v939_v2  ;;  %970 = vadd.xlane.f32.xlu2 %v969_v9 }
 0x239   :  { %v2307_v3 = vpop.eup %1531 }
 0x23a   :  { %v972_v55 = vsel %vm738_vm0, %v2307_v3, 0.0 }
 0x23b   :  { %973 = vadd.xlane.f32.xlu0 %v972_v55 }
 0x23e   :  { %v884_v4 = vpop.xlane.xlu0 %883 }
 0x23f   :  { %v924_v15 = vsub.f32 %v2230_v12, %v884_v4 }
 0x241   :  { %v943_v51 = vmul.f32 1.442695, %v924_v15 }
 0x246   :  { %v887_v8 = vpop.xlane.xlu0 %886 }
 0x247   :  { %v925_v19 = vsub.f32 %v2237_v24, %v887_v8 }
 0x249   :  { %v945_v22 = vmul.f32 1.442695, %v925_v19 }
 0x266   :  { %v899_v23 = vpop.xlane.xlu1 %898 }
 0x267   :  { %v929_v6 = vsub.f32 %v2241_v26, %v899_v23 }
 0x269   :  { %v953_v7 = vmul.f32 1.442695, %v929_v6 }
 0x26b   :  { %1533 = vpow2.f32 %v953_v7 }
 0x26c   :  { %1535 = vpow2.f32 %v943_v51 }
 0x26e   :  { %v902_v32 = vpop.xlane.xlu2 %901 }
 0x26f   :  { %v930_v52 = vsub.f32 %v2245_v27, %v902_v32 }
 0x271   :  { %v2314_v18 = vpop.eup %1533  ;;  %v955_v20 = vmul.f32 1.442695, %v930_v52 }
 0x272   :  { %v993_v21 = vsel %vm738_vm0, %v2314_v18, 0.0  ;;  %v2319_v13 = vpop.eup %1535 }
 0x273   :  { %1537 = vpow2.f32 %v955_v20  ;;  %994 = vadd.xlane.f32.xlu1 %v993_v21  ;;  %v978_v29 = vsel %vm738_vm0, %v2319_v13, 0.0 }
 0x274   :  { %1539 = vpow2.f32 %v945_v22 }
 0x276   :  { %v881_v12 = vpop.xlane.xlu2 %880  ;;  %v905_v26 = vpop.xlane.xlu1 %904 }
 0x277   :  { %v923_v25 = vsub.f32 %v2252_v30, %v881_v12  ;;  %v931_v27 = vsub.f32 %v2254_v35, %v905_v26 }
 0x279   :  { %v2323_v28 = vpop.eup %1537  ;;  %v941_v17 = vmul.f32 1.442695, %v923_v25  ;;  %v957_v24 = vmul.f32 1.442695, %v931_v27 }
 0x27a   :  { %v996_v31 = vsel %vm738_vm0, %v2323_v28, 0.0  ;;  %v2329_v30 = vpop.eup %1539 }
 0x27b   :  { %1541 = vpow2.f32 %v941_v17  ;;  %997 = vadd.xlane.f32.xlu2 %v996_v31  ;;  %979 = vadd.xlane.f32.xlu1 %v978_v29  ;;  %v981_v16 = vsel %vm738_vm0, %v2329_v30, 0.0 }
 0x27c   :  { %1543 = vpow2.f32 %v957_v24 }
 0x27e   :  { %v908_v53 = vpop.xlane.xlu2 %907  ;;  %v890_v36 = vpop.xlane.xlu1 %889 }
 0x27f   :  { %v932_v35 = vsub.f32 %v2265_v41, %v908_v53  ;;  %v926_v37 = vsub.f32 %v2263_v38, %v890_v36 }
 0x281   :  { %v2333_v39 = vpop.eup %1541  ;;  %v959_v33 = vmul.f32 1.442695, %v932_v35  ;;  %v947_v5 = vmul.f32 1.442695, %v926_v37 }
 0x282   :  { %v2335_v40 = vpop.eup %1543  ;;  %v975_v44 = vsel %vm738_vm0, %v2333_v39, 0.0 }
 0x283   :  { %1545 = vpow2.f32 %v959_v33  ;;  %976 = vadd.xlane.f32.xlu0 %v975_v44  ;;  %982 = vadd.xlane.f32.xlu1 %v981_v16  ;;  %v999_v41 = vsel %vm738_vm0, %v2335_v40, 0.0 }
 0x284   :  { %1547 = vpow2.f32 %v947_v5  ;;  %1000 = vadd.xlane.f32.xlu2 %v999_v41 }
 0x286   :  { %v911_v38 = vpop.xlane.xlu2 %910  ;;  %v893_v14 = vpop.xlane.xlu1 %892 }
 0x287   :  { %v933_v47 = vsub.f32 %v2276_v34, %v911_v38  ;;  %v927_v10 = vsub.f32 %v2274_v45, %v893_v14 }
 0x289   :  { %v2345_v11 = vpop.eup %1545  ;;  %v961_v49 = vmul.f32 1.442695, %v933_v47  ;;  %v949_v57 = vmul.f32 1.442695, %v927_v10 }
 0x28a   :  { %v2347_v58 = vpop.eup %1547  ;;  %v1002_v59 = vsel %vm738_vm0, %v2345_v11, 0.0 }
 0x28b   :  { %1549 = vpow2.f32 %v961_v49  ;;  %1003 = vadd.xlane.f32.xlu0 %v1002_v59  ;;  %v984_v61 = vsel %vm738_vm0, %v2347_v58, 0.0 }
 0x28c   :  { %1551 = vpow2.f32 %v949_v57  ;;  %985 = vadd.xlane.f32.xlu2 %v984_v61 }
 0x28e   :  { %v914_v42 = vpop.xlane.xlu0 %913  ;;  %v896_v34 = vpop.xlane.xlu2 %895 }
 0x28f   :  { %v934_v45 = vsub.f32 %v2287_v56, %v914_v42  ;;  %v928_v62 = vsub.f32 %v2285_v50, %v896_v34 }
 0x291   :  { %v2355_v43 = vpop.eup %1549  ;;  %v963_v54 = vmul.f32 1.442695, %v934_v45  ;;  %v951_v48 = vmul.f32 1.442695, %v928_v62 }
 0x292   :  { %v2357_v0 = vpop.eup %1551  ;;  %v1005_v1 = vsel %vm738_vm0, %v2355_v43, 0.0 }
 0x293   :  { %1553 = vpow2.f32 %v963_v54  ;;  %1006 = vadd.xlane.f32.xlu0 %v1005_v1  ;;  %v987_v2 = vsel %vm738_vm0, %v2357_v0, 0.0 }
 0x294   :  { %1555 = vpow2.f32 %v951_v48  ;;  %988 = vadd.xlane.f32.xlu2 %v987_v2 }
 0x296   :  { %v917_v9 = vpop.xlane.xlu0 %916 }
 0x297   :  { %v935_v56 = vsub.f32 %v2293_v60, %v917_v9 }
 0x299   :  { %v2364_v50 = vpop.eup %1553  ;;  %v965_v55 = vmul.f32 1.442695, %v935_v56 }
 0x29a   :  { %v2366_v4 = vpop.eup %1555  ;;  %v1008_v23 = vsel %vm738_vm0, %v2364_v50, 0.0 }
 0x29b   :  { %1557 = vpow2.f32 %v965_v55  ;;  %v990_v6 = vsel %vm738_vm0, %v2366_v4, 0.0  ;;  %1009 = vadd.xlane.f32.xlu1 %v1008_v23 }
 0x29c   :  { %991 = vadd.xlane.f32.xlu0 %v990_v6 }
 0x29e   :  { %v920_v15 = vpop.xlane.xlu1 %919 }
 0x29f   :  { %v936_v7 = vsub.f32 %v2298_v63, %v920_v15 }
 0x2a1   :  { %v2373_v51 = vpop.eup %1557  ;;  %v967_v60 = vmul.f32 1.442695, %v936_v7 }
 0x2a2   :  { %v1011_v8 = vsel %vm738_vm0, %v2373_v51, 0.0 }
 0x2a3   :  { %1559 = vpow2.f32 %v967_v60  ;;  %1012 = vadd.xlane.f32.xlu1 %v1011_v8 }
 0x2a6   :  { %v971_v32 = vpop.xlane.xlu2 %970 }
 0x2a7   :  { %1561 = vrcp.f32 %v971_v32 }
 0x2a9   :  { %v2377_v52 = vpop.eup %1559 }
 0x2aa   :  { %v1014_v19 = vsel %vm738_vm0, %v2377_v52, 0.0 }
 0x2ab   :  { %1015 = vadd.xlane.f32.xlu2 %v1014_v19 }
 0x2ad   :  { %v1562_v21 = vpop.eup %1561 }
 0x2ae   :  { %v974_v20 = vpop.xlane.xlu0 %973  ;;  %v1033_v63 = vmul.f32 %v1562_v21, %v2303_v46 }
 0x2af   :  { %1563 = vrcp.f32 %v974_v20 }
 0x2b0   :  { %v1049_v12 = vpack.c.bf16 %v1033_v63, %v1033_v63 }
 0x2b2   :  { %v1073_v27 = vunpack.c.l.b16 %v1049_v12 }
 0x2b5   :  { %v1564_v22 = vpop.eup %1563 }
 0x2b6   :  { %v1034_v26 = vmul.f32 %v1564_v22, %v2307_v3 }
 0x2b8   :  { %v1050_v25 = vpack.c.bf16 %v1034_v26, %v1034_v26 }
 0x2ba   :  { %v1074_v17 = vunpack.c.l.b16 %v1050_v25 }
 0x2bc   :  { %v1081_v24 = vpack.c.b16 %v1074_v17, %v1073_v27 }
 0x2be   :  { %1469 = vmatmul.msk.bf16.vlgmr.msra.gmra.mxu2 %vm738_vm0, %v1081_v24 }
 0x2e6   :  { %v995_v31 = vpop.xlane.xlu1 %994 }
 0x2e7   :  { %1565 = vrcp.f32 %v995_v31 }
 0x2ed   :  { %v1566_v36 = vpop.eup %1565 }
 0x2ee   :  { %v998_v29 = vpop.xlane.xlu2 %997  ;;  %v980_v53 = vpop.xlane.xlu1 %979  ;;  %v1041_v35 = vmul.f32 %v1566_v36, %v2314_v18 }
 0x2ef   :  { %1567 = vrcp.f32 %v998_v29 }
 0x2f0   :  { %1569 = vrcp.f32 %v980_v53  ;;  %v1057_v37 = vpack.c.bf16 %v1041_v35, %v1041_v35 }
 0x2f2   :  { %v1158_v41 = vunpack.c.l.b16 %v1057_v37 }
 0x2f5   :  { %v1568_v46 = vpop.eup %1567 }
 0x2f6   :  { %v1042_v33 = vmul.f32 %v1568_v46, %v2323_v28  ;;  %v977_v3 = vpop.xlane.xlu0 %976  ;;  %v1570_v5 = vpop.eup %1569 }
 0x2f7   :  { %1571 = vrcp.f32 %v977_v3  ;;  %v1001_v44 = vpop.xlane.xlu2 %1000  ;;  %v1036_v14 = vmul.f32 %v1570_v5, %v2319_v13  ;;  %v983_v18 = vpop.xlane.xlu1 %982 }
 0x2f8   :  { %v1058_v16 = vpack.c.bf16 %v1042_v33, %v1042_v33  ;;  %1573 = vrcp.f32 %v1001_v44 }
 0x2f9   :  { %v1052_v49 = vpack.c.bf16 %v1036_v14, %v1036_v14 }
 0x2fa   :  { %v1159_v38 = vunpack.c.l.b16 %v1058_v16 }
 0x2fb   :  { %v1076_v34 = vunpack.c.l.b16 %v1052_v49 }
 0x2fc   :  { %v1166_v47 = vpack.c.b16 %v1159_v38, %v1158_v41 }
 0x2fd   :  { %v1572_v10 = vpop.eup %1571 }
 0x2fe   :  { %v1035_v57 = vmul.f32 %v1572_v10, %v2333_v39  ;;  %v1004_v59 = vpop.xlane.xlu0 %1003  ;;  %1473 = vmatmul.msk.bf16.vlgmr.msra.gmra.mxu3 %vm738_vm0, %v1166_v47  ;;  %v1574_v28 = vpop.eup %1573 }
 0x2ff   :  { %1575 = vrcp.f32 %v1004_v59  ;;  %v986_v61 = vpop.xlane.xlu2 %985  ;;  %v1043_v62 = vmul.f32 %v1574_v28, %v2335_v40 }
 0x300   :  { %v1051_v42 = vpack.c.bf16 %v1035_v57, %v1035_v57  ;;  %1577 = vrcp.f32 %v986_v61 }
 0x301   :  { %1579 = vrcp.f32 %v983_v18  ;;  %v1059_v1 = vpack.c.bf16 %v1043_v62, %v1043_v62 }
 0x302   :  { %v1075_v45 = vunpack.c.l.b16 %v1051_v42 }
 0x303   :  { %v1160_v23 = vunpack.c.l.b16 %v1059_v1 }
 0x304   :  { %v1082_v13 = vpack.c.b16 %v1076_v34, %v1075_v45 }
 0x305   :  { %v1576_v54 = vpop.eup %1575 }
 0x306   :  { %v1578_v48 = vpop.eup %1577  ;;  %v1044_v39 = vmul.f32 %v1576_v54, %v2345_v11  ;;  %v1007_v2 = vpop.xlane.xlu0 %1006  ;;  %1470 = vmatmul.msk.bf16.gmra.mxu2 %vm738_vm0, %v1082_v13 }
 0x307   :  { %v1580_v9 = vpop.eup %1579  ;;  %v1038_v55 = vmul.f32 %v1578_v48, %v2347_v58  ;;  %1581 = vrcp.f32 %v1007_v2  ;;  %v989_v8 = vpop.xlane.xlu2 %988 }
 0x308   :  { %v1060_v56 = vpack.c.bf16 %v1044_v39, %v1044_v39  ;;  %v1037_v6 = vmul.f32 %v1580_v9, %v2329_v30 }
 0x309   :  { %v1054_v7 = vpack.c.bf16 %v1038_v55, %v1038_v55 }
 0x30a   :  { %v1161_v15 = vunpack.c.l.b16 %v1060_v56  ;;  %v1053_v60 = vpack.c.bf16 %v1037_v6, %v1037_v6 }
 0x30b   :  { %v1078_v20 = vunpack.c.l.b16 %v1054_v7 }
 0x30c   :  { %v1167_v40 = vpack.c.b16 %v1161_v15, %v1160_v23  ;;  %v1077_v21 = vunpack.c.l.b16 %v1053_v60 }
 0x30d   :  { %v1582_v11 = vpop.eup %1581 }
 0x30e   :  { %1474 = vmatmul.msk.bf16.gmra.mxu3 %vm738_vm0, %v1167_v40  ;;  %v1010_v32 = vpop.xlane.xlu1 %1009  ;;  %v1045_v58 = vmul.f32 %v1582_v11, %v2355_v43  ;;  %v1083_v63 = vpack.c.b16 %v1078_v20, %v1077_v21 }
 0x30f   :  { %v992_v19 = vpop.xlane.xlu0 %991  ;;  %1583 = vrcp.f32 %v1010_v32 }
 0x310   :  { %1585 = vrcp.f32 %v992_v19  ;;  %v1061_v12 = vpack.c.bf16 %v1045_v58, %v1045_v58 }
 0x311   :  { %1587 = vrcp.f32 %v989_v8 }
 0x312   :  { %v1162_v31 = vunpack.c.l.b16 %v1061_v12 }
 0x315   :  { %v1584_v22 = vpop.eup %1583 }
 0x316   :  { %v1586_v30 = vpop.eup %1585  ;;  %v1046_v26 = vmul.f32 %v1584_v22, %v2364_v50  ;;  %1471 = vmatmul.msk.bf16.gmra.mxu2 %vm738_vm0, %v1083_v63  ;;  %v1013_v25 = vpop.xlane.xlu1 %1012 }
 0x317   :  { %v1588_v27 = vpop.eup %1587  ;;  %v1040_v17 = vmul.f32 %v1586_v30, %v2366_v4  ;;  %1589 = vrcp.f32 %v1013_v25 }
 0x318   :  { %v1062_v24 = vpack.c.bf16 %v1046_v26, %v1046_v26  ;;  %v1039_v29 = vmul.f32 %v1588_v27, %v2357_v0 }
 0x319   :  { %v1056_v36 = vpack.c.bf16 %v1040_v17, %v1040_v17 }
 0x31a   :  { %v1163_v53 = vunpack.c.l.b16 %v1062_v24  ;;  %v1055_v35 = vpack.c.bf16 %v1039_v29, %v1039_v29 }
 0x31b   :  { %v1080_v50 = vunpack.c.l.b16 %v1056_v36 }
 0x31c   :  { %v1168_v43 = vpack.c.b16 %v1163_v53, %v1162_v31  ;;  %v1079_v33 = vunpack.c.l.b16 %v1055_v35 }
 0x31d   :  { %v1590_v37 = vpop.eup %1589 }
 0x31e   :  { %v1016_v46 = vpop.xlane.xlu2 %1015  ;;  %1475 = vmatmul.msk.bf16.gmra.mxu3 %vm738_vm0, %v1168_v43  ;;  %v1047_v3 = vmul.f32 %v1590_v37, %v2373_v51  ;;  %v1084_v5 = vpack.c.b16 %v1080_v50, %v1079_v33 }
 0x31f   :  { %1591 = vrcp.f32 %v1016_v46 }
 0x320   :  { %v1063_v44 = vpack.c.bf16 %v1047_v3, %v1047_v3 }
 0x322   :  { %v1164_v41 = vunpack.c.l.b16 %v1063_v44 }
 0x325   :  { %v1592_v4 = vpop.eup %1591 }
 0x326   :  { %v1048_v16 = vmul.f32 %v1592_v4, %v2377_v52  ;;  %1472 = vmatmul.msk.bf16.gmra.mxu2 %vm738_vm0, %v1084_v5 }
 0x328   :  { %v1064_v0 = vpack.c.bf16 %v1048_v16, %v1048_v16 }
 0x32a   :  { %v1165_v38 = vunpack.c.l.b16 %v1064_v0 }
 0x32c   :  { %v1169_v14 = vpack.c.b16 %v1165_v38, %v1164_v41 }
 0x32e   :  { %1476 = vmatmul.msk.bf16.gmra.mxu3 %vm738_vm0, %v1169_v14 }
 0x341   :  { %v1130_v47 = vpop.f32.mrf.mxu2 }
 0x342   :  { %1235 = vst.msk [vmem:[#allocation2] sm:$0xff] %vm738_vm0, %v1130_v47 }
 0x349   :  { %v1132_v10 = vpop.f32.mrf.mxu2 }
 0x34a   :  { %1236 = vst.msk [vmem:[#allocation2 + $0x8] sm:$0xff] %vm738_vm0, %v1132_v10 }
 0x381   :  { %v1215_v51 = vpop.f32.mrf.mxu3 }
 0x382   :  { %1243 = vst.msk [vmem:[#allocation2 + $0x40] sm:$0xff] %vm738_vm0, %v1215_v51 }
 0x389   :  { %v1135_v49 = vpop.f32.mrf.mxu2  ;;  %v1217_v57 = vpop.f32.mrf.mxu3 }
 0x38a   :  { %1237 = vst.msk [vmem:[#allocation2 + $0x10] sm:$0xff] %vm738_vm0, %v1135_v49 }
 0x38b   :  { %1244 = vst.msk [vmem:[#allocation2 + $0x48] sm:$0xff] %vm738_vm0, %v1217_v57 }
 0x391   :  { %v1137_v52 = vpop.f32.mrf.mxu2  ;;  %v1220_v18 = vpop.f32.mrf.mxu3 }
 0x392   :  { %1238 = vst.msk [vmem:[#allocation2 + $0x18] sm:$0xff] %vm738_vm0, %v1137_v52 }
 0x393   :  { %1245 = vst.msk [vmem:[#allocation2 + $0x50] sm:$0xff] %vm738_vm0, %v1220_v18 }
 0x399   :  { %v1140_v59 = vpop.f32.mrf.mxu2  ;;  %v1222_v28 = vpop.f32.mrf.mxu3 }
 0x39a   :  { %1239 = vst.msk [vmem:[#allocation2 + $0x20] sm:$0xff] %vm738_vm0, %v1140_v59 }
 0x39b   :  { %1246 = vst.msk [vmem:[#allocation2 + $0x58] sm:$0xff] %vm738_vm0, %v1222_v28 }
 0x3a1   :  { %v1142_v61 = vpop.f32.mrf.mxu2  ;;  %v1225_v42 = vpop.f32.mrf.mxu3 }
 0x3a2   :  { %1240 = vst.msk [vmem:[#allocation2 + $0x28] sm:$0xff] %vm738_vm0, %v1142_v61 }
 0x3a3   :  { %1247 = vst.msk [vmem:[#allocation2 + $0x60] sm:$0xff] %vm738_vm0, %v1225_v42 }
 0x3a9   :  { %v1145_v34 = vpop.f32.mrf.mxu2  ;;  %v1227_v45 = vpop.f32.mrf.mxu3 }
 0x3aa   :  { %1241 = vst.msk [vmem:[#allocation2 + $0x30] sm:$0xff] %vm738_vm0, %v1145_v34 }
 0x3ab   :  { %1248 = vst.msk [vmem:[#allocation2 + $0x68] sm:$0xff] %vm738_vm0, %v1227_v45 }
 0x3b1   :  { %v1147_v62 = vpop.f32.mrf.mxu2  ;;  %v1230_v13 = vpop.f32.mrf.mxu3 }
 0x3b2   :  { %1242 = vst.msk [vmem:[#allocation2 + $0x38] sm:$0xff] %vm738_vm0, %v1147_v62 }
 0x3b3   :  { %1249 = vst.msk [vmem:[#allocation2 + $0x70] sm:$0xff] %vm738_vm0, %v1230_v13 }
 0x3b9   :  { %v1232_v54 = vpop.f32.mrf.mxu3 }
 0x3ba   :  { %1250 = vst.msk [vmem:[#allocation2 + $0x78] sm:$0xff] %vm738_vm0, %v1232_v54 }
 0x3bb   :  { %1263 = dma.vmem_to_hbm [thread:$0]  %s1256_s18, 2048, %s1258_s21, [#allocation3], %s1621_s22, %s1621_s22, %s1622_s23  }
 0x3bc   :  { %1617 = dma.done.wait [#allocation3], 2048  }
 0x3bd   :  { %1618 = vsyncadd [#allocation3], 4294965248 }
 0x3be   :  { %1268 = vsyncpa [#allocation3], 1 }

</bundles_post_ra>
